<compile_context>
chip_gen: v7x
topology: tpu7x:2x2x1
jax: 0.10.0
libtpu: 0.0.40
codegen_flags: <defaults>
</compile_context>

<pallas_src>
import math

import jax
import jax.numpy as jnp
import numpy as np
from jax import lax
from jax.experimental import pallas as pl
from jax.experimental.pallas import tpu as pltpu


def lstm_autoencoder_kernel(x_ref, w_ie_ref, w_he_ref, b_e_ref,
                            w_id_ref, w_hd_ref, b_d_ref, out_ref):
    # x_ref:   (T, BB, D_in)  f32, time-major, one batch block
    # w_ie:    (D_in, 4*Hp)   bf16  encoder input->gates (gate cols padded)
    # w_he:    (H,    4*Hp)   bf16  encoder hidden->gates
    # b_e:     (1,    4*Hp)   f32   encoder bias (b_ih + b_hh), gate-padded
    # w_id:    (H,    4*Dp)   bf16  decoder input->gates (decoder input = h_enc)
    # w_hd:    (Do,   4*Dp)   bf16  decoder hidden->gates (Do == D_in)
    # b_d:     (1,    4*Dp)   f32   decoder bias, gate-padded
    # out_ref: (BB, T*Do)     f32   decoder hidden states, lane-dense
    T, BB, D_in = x_ref.shape
    H = w_he_ref.shape[0]
    Hp = w_he_ref.shape[1] // 4
    Do = w_hd_ref.shape[0]
    Dp = w_hd_ref.shape[1] // 4

    w_he = w_he_ref[...]
    w_hd = w_hd_ref[...]

    # ---- batched encoder input projection: one MXU matmul over all T steps.
    # (T, BB, D) -> (T*BB, D) merge is layout-free (BB == 8 sublanes, f32);
    # bf16 cast feeds the MXU, accumulation stays f32, bias folded in.
    x_flat = x_ref[...].reshape(T * BB, D_in).astype(jnp.bfloat16)
    xproj = (jnp.dot(x_flat, w_ie_ref[...],
                     preferred_element_type=jnp.float32) + b_e_ref[...])

    def cell(pre_gates, h, c, w_h, n, n_pad):
        # pre_gates already holds x-projection + bias; only the recurrent
        # bf16 h @ w_h matmul sits on the serial critical path.
        # TODO(synk): pltpu.matmul_push_rhs weight pinning / v7x MRB
        # accumulation of pre_gates would cut this further; see header note.
        gates = pre_gates + jnp.dot(h.astype(w_h.dtype), w_h,
                                    preferred_element_type=jnp.float32)
        sig = jax.nn.sigmoid(gates)          # full-width EUP pass
        th = jnp.tanh(gates)                 # full-width EUP pass
        i_g = sig[:, 0:n]
        f_g = sig[:, n_pad:n_pad + n]
        g_g = th[:, 2 * n_pad:2 * n_pad + n]
        o_g = sig[:, 3 * n_pad:3 * n_pad + n]
        c_new = f_g * c + i_g * g_g
        h_new = o_g * jnp.tanh(c_new)
        return h_new, c_new

    # ---- encoder recurrence (unrolled; only the final hidden state is kept)
    h = jnp.zeros((BB, H), jnp.float32)
    c = jnp.zeros((BB, H), jnp.float32)
    for t in range(T):
        h, c = cell(xproj[t * BB:(t + 1) * BB, :], h, c, w_he, H, Hp)
    h_enc = h

    # ---- decoder: input projection is loop-invariant (input == h_enc)
    dproj = (jnp.dot(h_enc.astype(jnp.bfloat16), w_id_ref[...],
                     preferred_element_type=jnp.float32) + b_d_ref[...])

    hd = jnp.zeros((BB, Do), jnp.float32)
    cd = jnp.zeros((BB, Do), jnp.float32)
    outs = []
    for t in range(T):
        hd, cd = cell(dproj, hd, cd, w_hd, Do, Dp)
        outs.append(hd)

    # single lane-dense store: (BB, T*Do); reshaped back in the wrapper
    out_ref[...] = jnp.concatenate(outs, axis=-1).astype(out_ref.dtype)


def _pad_gate_cols(w_t, n):
    """(in, 4*n) gate-ordered (i,f,g,o) -> (in, 4*n_pad), n_pad = ceil32(n).

    Each gate lands in its own 32-lane-multiple column block; padded columns
    are zero (never read back in the kernel)."""
    n_pad = ((n + 31) // 32) * 32
    if n_pad == n:
        return w_t, n_pad
    w4 = w_t.reshape(w_t.shape[0], 4, n)
    w4 = jnp.pad(w4, ((0, 0), (0, 0), (0, n_pad - n)))
    return w4.reshape(w_t.shape[0], 4 * n_pad), n_pad


def lstm_autoencoder(x, params):
    """x: (B, T, D_in) batch-first, like the PyTorch module. Returns (B, T, D_in)."""
    (w_ih_e, w_hh_e, b_ih_e, b_hh_e,
     w_ih_d, w_hh_d, b_ih_d, b_hh_d) = params
    B, T, D_in = x.shape
    H = w_hh_e.shape[1]

    # Batch padding / blocking: sublane-multiple rows, blocks of up to 128 so
    # large batches fill the MXU M dim and shard across TCs (v7x) via the
    # "parallel" grid axis.  At B=2 this gives Bp = BB = 8, grid = (1,).
    SUBLANE = 8
    B8 = max(((B + SUBLANE - 1) // SUBLANE) * SUBLANE, SUBLANE)
    BB = min(B8, 128)
    Bp = ((B8 + BB - 1) // BB) * BB
    n_blocks = Bp // BB

    # time-major input; zero-padded batch rows are row-independent and are
    # sliced off after the call.
    x_tm = jnp.transpose(x.astype(jnp.float32), (1, 0, 2))       # (T, B, D_in)
    if Bp != B:
        x_tm = jnp.pad(x_tm, ((0, 0), (0, Bp - B), (0, 0)))      # (T, Bp, D_in)

    # Weights transposed to (in, 4n), gate columns padded to 32-lane blocks,
    # cast to bf16 for the MXU; folded biases stay f32 (added post-accumulate).
    w_ie, _ = _pad_gate_cols(w_ih_e.T, H)
    w_he, _ = _pad_gate_cols(w_hh_e.T, H)
    b_e, _ = _pad_gate_cols((b_ih_e + b_hh_e)[None, :], H)
    w_id, _ = _pad_gate_cols(w_ih_d.T, D_in)
    w_hd, _ = _pad_gate_cols(w_hh_d.T, D_in)
    b_d, _ = _pad_gate_cols((b_ih_d + b_hh_d)[None, :], D_in)

    w_ie = w_ie.astype(jnp.bfloat16)
    w_he = w_he.astype(jnp.bfloat16)
    w_id = w_id.astype(jnp.bfloat16)
    w_hd = w_hd.astype(jnp.bfloat16)
    b_e = b_e.astype(jnp.float32)
    b_d = b_d.astype(jnp.float32)

    def replicated(arr):
        nd = arr.ndim
        return pl.BlockSpec(arr.shape, lambda b, _nd=nd: (0,) * _nd)

    out_flat = pl.pallas_call(
        lstm_autoencoder_kernel,
        out_shape=jax.ShapeDtypeStruct((Bp, T * D_in), jnp.float32),
        grid=(n_blocks,),
        in_specs=[pl.BlockSpec((T, BB, D_in), lambda b: (0, b, 0)),
                  replicated(w_ie), replicated(w_he), replicated(b_e),
                  replicated(w_id), replicated(w_hd), replicated(b_d)],
        out_specs=pl.BlockSpec((BB, T * D_in), lambda b: (b, 0)),
        compiler_params=pltpu.CompilerParams(
            dimension_semantics=("parallel",)),
    )(x_tm, w_ie, w_he, b_e, w_id, w_hd, b_d)

    # (Bp, T*D_in) -> (Bp, T, D_in) -> drop batch padding
    return out_flat.reshape(Bp, T, D_in)[:B]


# ---------------- pure-JAX f32 reference (mirrors nn.LSTM semantics) ---------
def _lstm_ref(x_seq, w_ih, w_hh, b_ih, b_hh):
    B = x_seq.shape[0]
    H = w_hh.shape[1]

    def cell(carry, x_t):
        h, c = carry
        gates = x_t @ w_ih.T + b_ih + h @ w_hh.T + b_hh
        i, f, g, o = jnp.split(gates, 4, axis=-1)
        i = jax.nn.sigmoid(i)
        f = jax.nn.sigmoid(f)
        g = jnp.tanh(g)
        o = jax.nn.sigmoid(o)
        c = f * c + i * g
        h = o * jnp.tanh(c)
        return (h, c), h

    init = (jnp.zeros((B, H), jnp.float32), jnp.zeros((B, H), jnp.float32))
    (h, _), ys = lax.scan(cell, init, jnp.swapaxes(x_seq, 0, 1))
    return jnp.swapaxes(ys, 0, 1), h


def _forward_ref(x, params):
    (w_ih_e, w_hh_e, b_ih_e, b_hh_e,
     w_ih_d, w_hh_d, b_ih_d, b_hh_d) = params
    T = x.shape[1]
    _, h = _lstm_ref(x, w_ih_e, w_hh_e, b_ih_e, b_hh_e)
    dec_in = jnp.repeat(h[:, None, :], T, axis=1)
    out, _ = _lstm_ref(dec_in, w_ih_d, w_hh_d, b_ih_d, b_hh_d)
    return out


if __name__ == "__main__":
    B, T, D_in, H = 2, 8, 16, 32

    key = jax.random.PRNGKey(0)
    ks = jax.random.split(key, 9)

    def uni(k, shape, bound):
        return jax.random.uniform(k, shape, jnp.float32, -bound, bound)

    be = 1.0 / math.sqrt(H)      # PyTorch nn.LSTM init bound (encoder)
    bd = 1.0 / math.sqrt(D_in)   # decoder hidden size == D_in

    params = (
        uni(ks[0], (4 * H, D_in), be),     # encoder weight_ih_l0
        uni(ks[1], (4 * H, H), be),        # encoder weight_hh_l0
        uni(ks[2], (4 * H,), be),          # encoder bias_ih_l0
        uni(ks[3], (4 * H,), be),          # encoder bias_hh_l0
        uni(ks[4], (4 * D_in, H), bd),     # decoder weight_ih_l0
        uni(ks[5], (4 * D_in, D_in), bd),  # decoder weight_hh_l0
        uni(ks[6], (4 * D_in,), bd),       # decoder bias_ih_l0
        uni(ks[7], (4 * D_in,), bd),       # decoder bias_hh_l0
    )

    x = jax.random.normal(ks[8], (B, T, D_in), jnp.float32)

    out = jax.block_until_ready(lstm_autoencoder(x, params))
    ref = jax.block_until_ready(_forward_ref(x, params))

    assert out.shape == (B, T, D_in)
    # Tolerance relaxed vs the pure-f32 version because the kernel uses bf16
    # MXU operands (f32 accumulation); observed error is ~1e-2 at these sizes.
    np.testing.assert_allclose(np.asarray(out), np.asarray(ref),
                               rtol=5e-2, atol=5e-2)
    print("KERNEL_OK")
</pallas_src>

<mosaic_0001>
module attributes {stable_mosaic.version = 11 : i64} {
  func.func @lstm_autoencoder_kernel(%arg0: i32, %arg1: memref<8x8x16xf32, #tpu.memory_space<vmem>>, %arg2: memref<16x128xbf16, #tpu.memory_space<vmem>>, %arg3: memref<32x128xbf16, #tpu.memory_space<vmem>>, %arg4: memref<1x128xf32, #tpu.memory_space<vmem>>, %arg5: memref<32x128xbf16, #tpu.memory_space<vmem>>, %arg6: memref<16x128xbf16, #tpu.memory_space<vmem>>, %arg7: memref<1x128xf32, #tpu.memory_space<vmem>>, %arg8: memref<8x128xf32, #tpu.memory_space<vmem>>) attributes {dimension_semantics = [#tpu.dimension_semantics<parallel>], iteration_bounds = array<i64: 1>, scalar_prefetch = 0 : i64, scratch_operands = 0 : i64, tpu.core_type = #tpu.core_type<tc>, window_params = [{transform_indices = @transform_0, window_bounds = array<i64: 8, 8, 16>}, {pipeline_mode = #tpu.pipeline_mode<synchronous>, transform_indices = @transform_1, window_bounds = array<i64: 16, 128>}, {pipeline_mode = #tpu.pipeline_mode<synchronous>, transform_indices = @transform_2, window_bounds = array<i64: 32, 128>}, {pipeline_mode = #tpu.pipeline_mode<synchronous>, transform_indices = @transform_3, window_bounds = array<i64: 1, 128>}, {pipeline_mode = #tpu.pipeline_mode<synchronous>, transform_indices = @transform_4, window_bounds = array<i64: 32, 128>}, {pipeline_mode = #tpu.pipeline_mode<synchronous>, transform_indices = @transform_5, window_bounds = array<i64: 16, 128>}, {pipeline_mode = #tpu.pipeline_mode<synchronous>, transform_indices = @transform_6, window_bounds = array<i64: 1, 128>}, {transform_indices = @transform_7, window_bounds = array<i64: 8, 128>}]} {
    %c0 = arith.constant 0 : index
    %c0_0 = arith.constant 0 : index
    %0 = vector.load %arg3[%c0, %c0_0] : memref<32x128xbf16, #tpu.memory_space<vmem>>, vector<32x128xbf16>
    %c0_1 = arith.constant 0 : index
    %c0_2 = arith.constant 0 : index
    %1 = vector.load %arg6[%c0_1, %c0_2] : memref<16x128xbf16, #tpu.memory_space<vmem>>, vector<16x128xbf16>
    %c0_3 = arith.constant 0 : index
    %c0_4 = arith.constant 0 : index
    %c0_5 = arith.constant 0 : index
    %2 = vector.load %arg1[%c0_3, %c0_4, %c0_5] : memref<8x8x16xf32, #tpu.memory_space<vmem>>, vector<8x8x16xf32>
    %3 = vector.shape_cast %2 : vector<8x8x16xf32> to vector<64x16xf32>
    %4 = arith.truncf %3 : vector<64x16xf32> to vector<64x16xbf16>
    %c0_6 = arith.constant 0 : index
    %c0_7 = arith.constant 0 : index
    %5 = vector.load %arg2[%c0_6, %c0_7] : memref<16x128xbf16, #tpu.memory_space<vmem>>, vector<16x128xbf16>
    %cst = arith.constant dense<0.000000e+00> : vector<64x128xf32>
    %6 = tpu.matmul %4, %5, %cst {dimension_numbers = #tpu.dot_dimension_numbers<[1], [0], [0], [1], [0, 0, 1, 1], [], []>} : vector<64x16xbf16>, vector<16x128xbf16>, vector<64x128xf32> -> vector<64x128xf32>
    %c0_8 = arith.constant 0 : index
    %c0_9 = arith.constant 0 : index
    %7 = vector.load %arg4[%c0_8, %c0_9] : memref<1x128xf32, #tpu.memory_space<vmem>>, vector<1x128xf32>
    %8 = vector.broadcast %7 : vector<1x128xf32> to vector<64x128xf32>
    %9 = arith.addf %6, %8 : vector<64x128xf32>
    %cst_10 = arith.constant 0.000000e+00 : f32
    %10 = vector.broadcast %cst_10 : f32 to vector<8x32xf32>
    %cst_11 = arith.constant 0.000000e+00 : f32
    %11 = vector.broadcast %cst_11 : f32 to vector<8x32xf32>
    %12 = vector.extract_strided_slice %9 {offsets = [0, 0], sizes = [8, 128], strides = [1, 1]} : vector<64x128xf32> to vector<8x128xf32>
    %13 = arith.truncf %10 : vector<8x32xf32> to vector<8x32xbf16>
    %cst_12 = arith.constant dense<0.000000e+00> : vector<8x128xf32>
    %14 = tpu.matmul %13, %0, %cst_12 {dimension_numbers = #tpu.dot_dimension_numbers<[1], [0], [0], [1], [0, 0, 1, 1], [], []>} : vector<8x32xbf16>, vector<32x128xbf16>, vector<8x128xf32> -> vector<8x128xf32>
    %15 = arith.addf %12, %14 : vector<8x128xf32>
    %16 = arith.negf %15 : vector<8x128xf32>
    %17 = math.exp %16 : vector<8x128xf32>
    %cst_13 = arith.constant 1.000000e+00 : f32
    %18 = vector.broadcast %cst_13 : f32 to vector<8x128xf32>
    %19 = arith.addf %18, %17 : vector<8x128xf32>
    %20 = arith.divf %18, %19 : vector<8x128xf32>
    %21 = math.tanh %15 : vector<8x128xf32>
    %22 = vector.extract_strided_slice %20 {offsets = [0, 0], sizes = [8, 32], strides = [1, 1]} : vector<8x128xf32> to vector<8x32xf32>
    %23 = vector.extract_strided_slice %20 {offsets = [0, 32], sizes = [8, 32], strides = [1, 1]} : vector<8x128xf32> to vector<8x32xf32>
    %24 = vector.extract_strided_slice %21 {offsets = [0, 64], sizes = [8, 32], strides = [1, 1]} : vector<8x128xf32> to vector<8x32xf32>
    %25 = vector.extract_strided_slice %20 {offsets = [0, 96], sizes = [8, 32], strides = [1, 1]} : vector<8x128xf32> to vector<8x32xf32>
    %26 = arith.mulf %23, %11 : vector<8x32xf32>
    %27 = arith.mulf %22, %24 : vector<8x32xf32>
    %28 = arith.addf %26, %27 : vector<8x32xf32>
    %29 = math.tanh %28 : vector<8x32xf32>
    %30 = arith.mulf %25, %29 : vector<8x32xf32>
    %31 = vector.extract_strided_slice %9 {offsets = [8, 0], sizes = [8, 128], strides = [1, 1]} : vector<64x128xf32> to vector<8x128xf32>
    %32 = arith.truncf %30 : vector<8x32xf32> to vector<8x32xbf16>
    %cst_14 = arith.constant dense<0.000000e+00> : vector<8x128xf32>
    %33 = tpu.matmul %32, %0, %cst_14 {dimension_numbers = #tpu.dot_dimension_numbers<[1], [0], [0], [1], [0, 0, 1, 1], [], []>} : vector<8x32xbf16>, vector<32x128xbf16>, vector<8x128xf32> -> vector<8x128xf32>
    %34 = arith.addf %31, %33 : vector<8x128xf32>
    %35 = arith.negf %34 : vector<8x128xf32>
    %36 = math.exp %35 : vector<8x128xf32>
    %cst_15 = arith.constant 1.000000e+00 : f32
    %37 = vector.broadcast %cst_15 : f32 to vector<8x128xf32>
    %38 = arith.addf %37, %36 : vector<8x128xf32>
    %39 = arith.divf %37, %38 : vector<8x128xf32>
    %40 = math.tanh %34 : vector<8x128xf32>
    %41 = vector.extract_strided_slice %39 {offsets = [0, 0], sizes = [8, 32], strides = [1, 1]} : vector<8x128xf32> to vector<8x32xf32>
    %42 = vector.extract_strided_slice %39 {offsets = [0, 32], sizes = [8, 32], strides = [1, 1]} : vector<8x128xf32> to vector<8x32xf32>
    %43 = vector.extract_strided_slice %40 {offsets = [0, 64], sizes = [8, 32], strides = [1, 1]} : vector<8x128xf32> to vector<8x32xf32>
    %44 = vector.extract_strided_slice %39 {offsets = [0, 96], sizes = [8, 32], strides = [1, 1]} : vector<8x128xf32> to vector<8x32xf32>
    %45 = arith.mulf %42, %28 : vector<8x32xf32>
    %46 = arith.mulf %41, %43 : vector<8x32xf32>
    %47 = arith.addf %45, %46 : vector<8x32xf32>
    %48 = math.tanh %47 : vector<8x32xf32>
    %49 = arith.mulf %44, %48 : vector<8x32xf32>
    %50 = vector.extract_strided_slice %9 {offsets = [16, 0], sizes = [8, 128], strides = [1, 1]} : vector<64x128xf32> to vector<8x128xf32>
    %51 = arith.truncf %49 : vector<8x32xf32> to vector<8x32xbf16>
    %cst_16 = arith.constant dense<0.000000e+00> : vector<8x128xf32>
    %52 = tpu.matmul %51, %0, %cst_16 {dimension_numbers = #tpu.dot_dimension_numbers<[1], [0], [0], [1], [0, 0, 1, 1], [], []>} : vector<8x32xbf16>, vector<32x128xbf16>, vector<8x128xf32> -> vector<8x128xf32>
    %53 = arith.addf %50, %52 : vector<8x128xf32>
    %54 = arith.negf %53 : vector<8x128xf32>
    %55 = math.exp %54 : vector<8x128xf32>
    %cst_17 = arith.constant 1.000000e+00 : f32
    %56 = vector.broadcast %cst_17 : f32 to vector<8x128xf32>
    %57 = arith.addf %56, %55 : vector<8x128xf32>
    %58 = arith.divf %56, %57 : vector<8x128xf32>
    %59 = math.tanh %53 : vector<8x128xf32>
    %60 = vector.extract_strided_slice %58 {offsets = [0, 0], sizes = [8, 32], strides = [1, 1]} : vector<8x128xf32> to vector<8x32xf32>
    %61 = vector.extract_strided_slice %58 {offsets = [0, 32], sizes = [8, 32], strides = [1, 1]} : vector<8x128xf32> to vector<8x32xf32>
    %62 = vector.extract_strided_slice %59 {offsets = [0, 64], sizes = [8, 32], strides = [1, 1]} : vector<8x128xf32> to vector<8x32xf32>
    %63 = vector.extract_strided_slice %58 {offsets = [0, 96], sizes = [8, 32], strides = [1, 1]} : vector<8x128xf32> to vector<8x32xf32>
    %64 = arith.mulf %61, %47 : vector<8x32xf32>
    %65 = arith.mulf %60, %62 : vector<8x32xf32>
    %66 = arith.addf %64, %65 : vector<8x32xf32>
    %67 = math.tanh %66 : vector<8x32xf32>
    %68 = arith.mulf %63, %67 : vector<8x32xf32>
    %69 = vector.extract_strided_slice %9 {offsets = [24, 0], sizes = [8, 128], strides = [1, 1]} : vector<64x128xf32> to vector<8x128xf32>
    %70 = arith.truncf %68 : vector<8x32xf32> to vector<8x32xbf16>
    %cst_18 = arith.constant dense<0.000000e+00> : vector<8x128xf32>
    %71 = tpu.matmul %70, %0, %cst_18 {dimension_numbers = #tpu.dot_dimension_numbers<[1], [0], [0], [1], [0, 0, 1, 1], [], []>} : vector<8x32xbf16>, vector<32x128xbf16>, vector<8x128xf32> -> vector<8x128xf32>
    %72 = arith.addf %69, %71 : vector<8x128xf32>
    %73 = arith.negf %72 : vector<8x128xf32>
    %74 = math.exp %73 : vector<8x128xf32>
    %cst_19 = arith.constant 1.000000e+00 : f32
    %75 = vector.broadcast %cst_19 : f32 to vector<8x128xf32>
    %76 = arith.addf %75, %74 : vector<8x128xf32>
    %77 = arith.divf %75, %76 : vector<8x128xf32>
    %78 = math.tanh %72 : vector<8x128xf32>
    %79 = vector.extract_strided_slice %77 {offsets = [0, 0], sizes = [8, 32], strides = [1, 1]} : vector<8x128xf32> to vector<8x32xf32>
    %80 = vector.extract_strided_slice %77 {offsets = [0, 32], sizes = [8, 32], strides = [1, 1]} : vector<8x128xf32> to vector<8x32xf32>
    %81 = vector.extract_strided_slice %78 {offsets = [0, 64], sizes = [8, 32], strides = [1, 1]} : vector<8x128xf32> to vector<8x32xf32>
    %82 = vector.extract_strided_slice %77 {offsets = [0, 96], sizes = [8, 32], strides = [1, 1]} : vector<8x128xf32> to vector<8x32xf32>
    %83 = arith.mulf %80, %66 : vector<8x32xf32>
    %84 = arith.mulf %79, %81 : vector<8x32xf32>
    %85 = arith.addf %83, %84 : vector<8x32xf32>
    %86 = math.tanh %85 : vector<8x32xf32>
    %87 = arith.mulf %82, %86 : vector<8x32xf32>
    %88 = vector.extract_strided_slice %9 {offsets = [32, 0], sizes = [8, 128], strides = [1, 1]} : vector<64x128xf32> to vector<8x128xf32>
    %89 = arith.truncf %87 : vector<8x32xf32> to vector<8x32xbf16>
    %cst_20 = arith.constant dense<0.000000e+00> : vector<8x128xf32>
    %90 = tpu.matmul %89, %0, %cst_20 {dimension_numbers = #tpu.dot_dimension_numbers<[1], [0], [0], [1], [0, 0, 1, 1], [], []>} : vector<8x32xbf16>, vector<32x128xbf16>, vector<8x128xf32> -> vector<8x128xf32>
    %91 = arith.addf %88, %90 : vector<8x128xf32>
    %92 = arith.negf %91 : vector<8x128xf32>
    %93 = math.exp %92 : vector<8x128xf32>
    %cst_21 = arith.constant 1.000000e+00 : f32
    %94 = vector.broadcast %cst_21 : f32 to vector<8x128xf32>
    %95 = arith.addf %94, %93 : vector<8x128xf32>
    %96 = arith.divf %94, %95 : vector<8x128xf32>
    %97 = math.tanh %91 : vector<8x128xf32>
    %98 = vector.extract_strided_slice %96 {offsets = [0, 0], sizes = [8, 32], strides = [1, 1]} : vector<8x128xf32> to vector<8x32xf32>
    %99 = vector.extract_strided_slice %96 {offsets = [0, 32], sizes = [8, 32], strides = [1, 1]} : vector<8x128xf32> to vector<8x32xf32>
    %100 = vector.extract_strided_slice %97 {offsets = [0, 64], sizes = [8, 32], strides = [1, 1]} : vector<8x128xf32> to vector<8x32xf32>
    %101 = vector.extract_strided_slice %96 {offsets = [0, 96], sizes = [8, 32], strides = [1, 1]} : vector<8x128xf32> to vector<8x32xf32>
    %102 = arith.mulf %99, %85 : vector<8x32xf32>
    %103 = arith.mulf %98, %100 : vector<8x32xf32>
    %104 = arith.addf %102, %103 : vector<8x32xf32>
    %105 = math.tanh %104 : vector<8x32xf32>
    %106 = arith.mulf %101, %105 : vector<8x32xf32>
    %107 = vector.extract_strided_slice %9 {offsets = [40, 0], sizes = [8, 128], strides = [1, 1]} : vector<64x128xf32> to vector<8x128xf32>
    %108 = arith.truncf %106 : vector<8x32xf32> to vector<8x32xbf16>
    %cst_22 = arith.constant dense<0.000000e+00> : vector<8x128xf32>
    %109 = tpu.matmul %108, %0, %cst_22 {dimension_numbers = #tpu.dot_dimension_numbers<[1], [0], [0], [1], [0, 0, 1, 1], [], []>} : vector<8x32xbf16>, vector<32x128xbf16>, vector<8x128xf32> -> vector<8x128xf32>
    %110 = arith.addf %107, %109 : vector<8x128xf32>
    %111 = arith.negf %110 : vector<8x128xf32>
    %112 = math.exp %111 : vector<8x128xf32>
    %cst_23 = arith.constant 1.000000e+00 : f32
    %113 = vector.broadcast %cst_23 : f32 to vector<8x128xf32>
    %114 = arith.addf %113, %112 : vector<8x128xf32>
    %115 = arith.divf %113, %114 : vector<8x128xf32>
    %116 = math.tanh %110 : vector<8x128xf32>
    %117 = vector.extract_strided_slice %115 {offsets = [0, 0], sizes = [8, 32], strides = [1, 1]} : vector<8x128xf32> to vector<8x32xf32>
    %118 = vector.extract_strided_slice %115 {offsets = [0, 32], sizes = [8, 32], strides = [1, 1]} : vector<8x128xf32> to vector<8x32xf32>
    %119 = vector.extract_strided_slice %116 {offsets = [0, 64], sizes = [8, 32], strides = [1, 1]} : vector<8x128xf32> to vector<8x32xf32>
    %120 = vector.extract_strided_slice %115 {offsets = [0, 96], sizes = [8, 32], strides = [1, 1]} : vector<8x128xf32> to vector<8x32xf32>
    %121 = arith.mulf %118, %104 : vector<8x32xf32>
    %122 = arith.mulf %117, %119 : vector<8x32xf32>
    %123 = arith.addf %121, %122 : vector<8x32xf32>
    %124 = math.tanh %123 : vector<8x32xf32>
    %125 = arith.mulf %120, %124 : vector<8x32xf32>
    %126 = vector.extract_strided_slice %9 {offsets = [48, 0], sizes = [8, 128], strides = [1, 1]} : vector<64x128xf32> to vector<8x128xf32>
    %127 = arith.truncf %125 : vector<8x32xf32> to vector<8x32xbf16>
    %cst_24 = arith.constant dense<0.000000e+00> : vector<8x128xf32>
    %128 = tpu.matmul %127, %0, %cst_24 {dimension_numbers = #tpu.dot_dimension_numbers<[1], [0], [0], [1], [0, 0, 1, 1], [], []>} : vector<8x32xbf16>, vector<32x128xbf16>, vector<8x128xf32> -> vector<8x128xf32>
    %129 = arith.addf %126, %128 : vector<8x128xf32>
    %130 = arith.negf %129 : vector<8x128xf32>
    %131 = math.exp %130 : vector<8x128xf32>
    %cst_25 = arith.constant 1.000000e+00 : f32
    %132 = vector.broadcast %cst_25 : f32 to vector<8x128xf32>
    %133 = arith.addf %132, %131 : vector<8x128xf32>
    %134 = arith.divf %132, %133 : vector<8x128xf32>
    %135 = math.tanh %129 : vector<8x128xf32>
    %136 = vector.extract_strided_slice %134 {offsets = [0, 0], sizes = [8, 32], strides = [1, 1]} : vector<8x128xf32> to vector<8x32xf32>
    %137 = vector.extract_strided_slice %134 {offsets = [0, 32], sizes = [8, 32], strides = [1, 1]} : vector<8x128xf32> to vector<8x32xf32>
    %138 = vector.extract_strided_slice %135 {offsets = [0, 64], sizes = [8, 32], strides = [1, 1]} : vector<8x128xf32> to vector<8x32xf32>
    %139 = vector.extract_strided_slice %134 {offsets = [0, 96], sizes = [8, 32], strides = [1, 1]} : vector<8x128xf32> to vector<8x32xf32>
    %140 = arith.mulf %137, %123 : vector<8x32xf32>
    %141 = arith.mulf %136, %138 : vector<8x32xf32>
    %142 = arith.addf %140, %141 : vector<8x32xf32>
    %143 = math.tanh %142 : vector<8x32xf32>
    %144 = arith.mulf %139, %143 : vector<8x32xf32>
    %145 = vector.extract_strided_slice %9 {offsets = [56, 0], sizes = [8, 128], strides = [1, 1]} : vector<64x128xf32> to vector<8x128xf32>
    %146 = arith.truncf %144 : vector<8x32xf32> to vector<8x32xbf16>
    %cst_26 = arith.constant dense<0.000000e+00> : vector<8x128xf32>
    %147 = tpu.matmul %146, %0, %cst_26 {dimension_numbers = #tpu.dot_dimension_numbers<[1], [0], [0], [1], [0, 0, 1, 1], [], []>} : vector<8x32xbf16>, vector<32x128xbf16>, vector<8x128xf32> -> vector<8x128xf32>
    %148 = arith.addf %145, %147 : vector<8x128xf32>
    %149 = arith.negf %148 : vector<8x128xf32>
    %150 = math.exp %149 : vector<8x128xf32>
    %cst_27 = arith.constant 1.000000e+00 : f32
    %151 = vector.broadcast %cst_27 : f32 to vector<8x128xf32>
    %152 = arith.addf %151, %150 : vector<8x128xf32>
    %153 = arith.divf %151, %152 : vector<8x128xf32>
    %154 = math.tanh %148 : vector<8x128xf32>
    %155 = vector.extract_strided_slice %153 {offsets = [0, 0], sizes = [8, 32], strides = [1, 1]} : vector<8x128xf32> to vector<8x32xf32>
    %156 = vector.extract_strided_slice %153 {offsets = [0, 32], sizes = [8, 32], strides = [1, 1]} : vector<8x128xf32> to vector<8x32xf32>
    %157 = vector.extract_strided_slice %154 {offsets = [0, 64], sizes = [8, 32], strides = [1, 1]} : vector<8x128xf32> to vector<8x32xf32>
    %158 = vector.extract_strided_slice %153 {offsets = [0, 96], sizes = [8, 32], strides = [1, 1]} : vector<8x128xf32> to vector<8x32xf32>
    %159 = arith.mulf %156, %142 : vector<8x32xf32>
    %160 = arith.mulf %155, %157 : vector<8x32xf32>
    %161 = arith.addf %159, %160 : vector<8x32xf32>
    %162 = math.tanh %161 : vector<8x32xf32>
    %163 = arith.mulf %158, %162 : vector<8x32xf32>
    %164 = arith.truncf %163 : vector<8x32xf32> to vector<8x32xbf16>
    %c0_28 = arith.constant 0 : index
    %c0_29 = arith.constant 0 : index
    %165 = vector.load %arg5[%c0_28, %c0_29] : memref<32x128xbf16, #tpu.memory_space<vmem>>, vector<32x128xbf16>
    %cst_30 = arith.constant dense<0.000000e+00> : vector<8x128xf32>
    %166 = tpu.matmul %164, %165, %cst_30 {dimension_numbers = #tpu.dot_dimension_numbers<[1], [0], [0], [1], [0, 0, 1, 1], [], []>} : vector<8x32xbf16>, vector<32x128xbf16>, vector<8x128xf32> -> vector<8x128xf32>
    %c0_31 = arith.constant 0 : index
    %c0_32 = arith.constant 0 : index
    %167 = vector.load %arg7[%c0_31, %c0_32] : memref<1x128xf32, #tpu.memory_space<vmem>>, vector<1x128xf32>
    %168 = vector.broadcast %167 : vector<1x128xf32> to vector<8x128xf32>
    %169 = arith.addf %166, %168 : vector<8x128xf32>
    %cst_33 = arith.constant 0.000000e+00 : f32
    %170 = vector.broadcast %cst_33 : f32 to vector<8x16xf32>
    %cst_34 = arith.constant 0.000000e+00 : f32
    %171 = vector.broadcast %cst_34 : f32 to vector<8x16xf32>
    %172 = arith.truncf %170 : vector<8x16xf32> to vector<8x16xbf16>
    %cst_35 = arith.constant dense<0.000000e+00> : vector<8x128xf32>
    %173 = tpu.matmul %172, %1, %cst_35 {dimension_numbers = #tpu.dot_dimension_numbers<[1], [0], [0], [1], [0, 0, 1, 1], [], []>} : vector<8x16xbf16>, vector<16x128xbf16>, vector<8x128xf32> -> vector<8x128xf32>
    %174 = arith.addf %169, %173 : vector<8x128xf32>
    %175 = arith.negf %174 : vector<8x128xf32>
    %176 = math.exp %175 : vector<8x128xf32>
    %cst_36 = arith.constant 1.000000e+00 : f32
    %177 = vector.broadcast %cst_36 : f32 to vector<8x128xf32>
    %178 = arith.addf %177, %176 : vector<8x128xf32>
    %179 = arith.divf %177, %178 : vector<8x128xf32>
    %180 = math.tanh %174 : vector<8x128xf32>
    %181 = vector.extract_strided_slice %179 {offsets = [0, 0], sizes = [8, 16], strides = [1, 1]} : vector<8x128xf32> to vector<8x16xf32>
    %182 = vector.extract_strided_slice %179 {offsets = [0, 32], sizes = [8, 16], strides = [1, 1]} : vector<8x128xf32> to vector<8x16xf32>
    %183 = vector.extract_strided_slice %180 {offsets = [0, 64], sizes = [8, 16], strides = [1, 1]} : vector<8x128xf32> to vector<8x16xf32>
    %184 = vector.extract_strided_slice %179 {offsets = [0, 96], sizes = [8, 16], strides = [1, 1]} : vector<8x128xf32> to vector<8x16xf32>
    %185 = arith.mulf %182, %171 : vector<8x16xf32>
    %186 = arith.mulf %181, %183 : vector<8x16xf32>
    %187 = arith.addf %185, %186 : vector<8x16xf32>
    %188 = math.tanh %187 : vector<8x16xf32>
    %189 = arith.mulf %184, %188 : vector<8x16xf32>
    %190 = arith.truncf %189 : vector<8x16xf32> to vector<8x16xbf16>
    %cst_37 = arith.constant dense<0.000000e+00> : vector<8x128xf32>
    %191 = tpu.matmul %190, %1, %cst_37 {dimension_numbers = #tpu.dot_dimension_numbers<[1], [0], [0], [1], [0, 0, 1, 1], [], []>} : vector<8x16xbf16>, vector<16x128xbf16>, vector<8x128xf32> -> vector<8x128xf32>
    %192 = arith.addf %169, %191 : vector<8x128xf32>
    %193 = arith.negf %192 : vector<8x128xf32>
    %194 = math.exp %193 : vector<8x128xf32>
    %cst_38 = arith.constant 1.000000e+00 : f32
    %195 = vector.broadcast %cst_38 : f32 to vector<8x128xf32>
    %196 = arith.addf %195, %194 : vector<8x128xf32>
    %197 = arith.divf %195, %196 : vector<8x128xf32>
    %198 = math.tanh %192 : vector<8x128xf32>
    %199 = vector.extract_strided_slice %197 {offsets = [0, 0], sizes = [8, 16], strides = [1, 1]} : vector<8x128xf32> to vector<8x16xf32>
    %200 = vector.extract_strided_slice %197 {offsets = [0, 32], sizes = [8, 16], strides = [1, 1]} : vector<8x128xf32> to vector<8x16xf32>
    %201 = vector.extract_strided_slice %198 {offsets = [0, 64], sizes = [8, 16], strides = [1, 1]} : vector<8x128xf32> to vector<8x16xf32>
    %202 = vector.extract_strided_slice %197 {offsets = [0, 96], sizes = [8, 16], strides = [1, 1]} : vector<8x128xf32> to vector<8x16xf32>
    %203 = arith.mulf %200, %187 : vector<8x16xf32>
    %204 = arith.mulf %199, %201 : vector<8x16xf32>
    %205 = arith.addf %203, %204 : vector<8x16xf32>
    %206 = math.tanh %205 : vector<8x16xf32>
    %207 = arith.mulf %202, %206 : vector<8x16xf32>
    %208 = arith.truncf %207 : vector<8x16xf32> to vector<8x16xbf16>
    %cst_39 = arith.constant dense<0.000000e+00> : vector<8x128xf32>
    %209 = tpu.matmul %208, %1, %cst_39 {dimension_numbers = #tpu.dot_dimension_numbers<[1], [0], [0], [1], [0, 0, 1, 1], [], []>} : vector<8x16xbf16>, vector<16x128xbf16>, vector<8x128xf32> -> vector<8x128xf32>
    %210 = arith.addf %169, %209 : vector<8x128xf32>
    %211 = arith.negf %210 : vector<8x128xf32>
    %212 = math.exp %211 : vector<8x128xf32>
    %cst_40 = arith.constant 1.000000e+00 : f32
    %213 = vector.broadcast %cst_40 : f32 to vector<8x128xf32>
    %214 = arith.addf %213, %212 : vector<8x128xf32>
    %215 = arith.divf %213, %214 : vector<8x128xf32>
    %216 = math.tanh %210 : vector<8x128xf32>
    %217 = vector.extract_strided_slice %215 {offsets = [0, 0], sizes = [8, 16], strides = [1, 1]} : vector<8x128xf32> to vector<8x16xf32>
    %218 = vector.extract_strided_slice %215 {offsets = [0, 32], sizes = [8, 16], strides = [1, 1]} : vector<8x128xf32> to vector<8x16xf32>
    %219 = vector.extract_strided_slice %216 {offsets = [0, 64], sizes = [8, 16], strides = [1, 1]} : vector<8x128xf32> to vector<8x16xf32>
    %220 = vector.extract_strided_slice %215 {offsets = [0, 96], sizes = [8, 16], strides = [1, 1]} : vector<8x128xf32> to vector<8x16xf32>
    %221 = arith.mulf %218, %205 : vector<8x16xf32>
    %222 = arith.mulf %217, %219 : vector<8x16xf32>
    %223 = arith.addf %221, %222 : vector<8x16xf32>
    %224 = math.tanh %223 : vector<8x16xf32>
    %225 = arith.mulf %220, %224 : vector<8x16xf32>
    %226 = arith.truncf %225 : vector<8x16xf32> to vector<8x16xbf16>
    %cst_41 = arith.constant dense<0.000000e+00> : vector<8x128xf32>
    %227 = tpu.matmul %226, %1, %cst_41 {dimension_numbers = #tpu.dot_dimension_numbers<[1], [0], [0], [1], [0, 0, 1, 1], [], []>} : vector<8x16xbf16>, vector<16x128xbf16>, vector<8x128xf32> -> vector<8x128xf32>
    %228 = arith.addf %169, %227 : vector<8x128xf32>
    %229 = arith.negf %228 : vector<8x128xf32>
    %230 = math.exp %229 : vector<8x128xf32>
    %cst_42 = arith.constant 1.000000e+00 : f32
    %231 = vector.broadcast %cst_42 : f32 to vector<8x128xf32>
    %232 = arith.addf %231, %230 : vector<8x128xf32>
    %233 = arith.divf %231, %232 : vector<8x128xf32>
    %234 = math.tanh %228 : vector<8x128xf32>
    %235 = vector.extract_strided_slice %233 {offsets = [0, 0], sizes = [8, 16], strides = [1, 1]} : vector<8x128xf32> to vector<8x16xf32>
    %236 = vector.extract_strided_slice %233 {offsets = [0, 32], sizes = [8, 16], strides = [1, 1]} : vector<8x128xf32> to vector<8x16xf32>
    %237 = vector.extract_strided_slice %234 {offsets = [0, 64], sizes = [8, 16], strides = [1, 1]} : vector<8x128xf32> to vector<8x16xf32>
    %238 = vector.extract_strided_slice %233 {offsets = [0, 96], sizes = [8, 16], strides = [1, 1]} : vector<8x128xf32> to vector<8x16xf32>
    %239 = arith.mulf %236, %223 : vector<8x16xf32>
    %240 = arith.mulf %235, %237 : vector<8x16xf32>
    %241 = arith.addf %239, %240 : vector<8x16xf32>
    %242 = math.tanh %241 : vector<8x16xf32>
    %243 = arith.mulf %238, %242 : vector<8x16xf32>
    %244 = arith.truncf %243 : vector<8x16xf32> to vector<8x16xbf16>
    %cst_43 = arith.constant dense<0.000000e+00> : vector<8x128xf32>
    %245 = tpu.matmul %244, %1, %cst_43 {dimension_numbers = #tpu.dot_dimension_numbers<[1], [0], [0], [1], [0, 0, 1, 1], [], []>} : vector<8x16xbf16>, vector<16x128xbf16>, vector<8x128xf32> -> vector<8x128xf32>
    %246 = arith.addf %169, %245 : vector<8x128xf32>
    %247 = arith.negf %246 : vector<8x128xf32>
    %248 = math.exp %247 : vector<8x128xf32>
    %cst_44 = arith.constant 1.000000e+00 : f32
    %249 = vector.broadcast %cst_44 : f32 to vector<8x128xf32>
    %250 = arith.addf %249, %248 : vector<8x128xf32>
    %251 = arith.divf %249, %250 : vector<8x128xf32>
    %252 = math.tanh %246 : vector<8x128xf32>
    %253 = vector.extract_strided_slice %251 {offsets = [0, 0], sizes = [8, 16], strides = [1, 1]} : vector<8x128xf32> to vector<8x16xf32>
    %254 = vector.extract_strided_slice %251 {offsets = [0, 32], sizes = [8, 16], strides = [1, 1]} : vector<8x128xf32> to vector<8x16xf32>
    %255 = vector.extract_strided_slice %252 {offsets = [0, 64], sizes = [8, 16], strides = [1, 1]} : vector<8x128xf32> to vector<8x16xf32>
    %256 = vector.extract_strided_slice %251 {offsets = [0, 96], sizes = [8, 16], strides = [1, 1]} : vector<8x128xf32> to vector<8x16xf32>
    %257 = arith.mulf %254, %241 : vector<8x16xf32>
    %258 = arith.mulf %253, %255 : vector<8x16xf32>
    %259 = arith.addf %257, %258 : vector<8x16xf32>
    %260 = math.tanh %259 : vector<8x16xf32>
    %261 = arith.mulf %256, %260 : vector<8x16xf32>
    %262 = arith.truncf %261 : vector<8x16xf32> to vector<8x16xbf16>
    %cst_45 = arith.constant dense<0.000000e+00> : vector<8x128xf32>
    %263 = tpu.matmul %262, %1, %cst_45 {dimension_numbers = #tpu.dot_dimension_numbers<[1], [0], [0], [1], [0, 0, 1, 1], [], []>} : vector<8x16xbf16>, vector<16x128xbf16>, vector<8x128xf32> -> vector<8x128xf32>
    %264 = arith.addf %169, %263 : vector<8x128xf32>
    %265 = arith.negf %264 : vector<8x128xf32>
    %266 = math.exp %265 : vector<8x128xf32>
    %cst_46 = arith.constant 1.000000e+00 : f32
    %267 = vector.broadcast %cst_46 : f32 to vector<8x128xf32>
    %268 = arith.addf %267, %266 : vector<8x128xf32>
    %269 = arith.divf %267, %268 : vector<8x128xf32>
    %270 = math.tanh %264 : vector<8x128xf32>
    %271 = vector.extract_strided_slice %269 {offsets = [0, 0], sizes = [8, 16], strides = [1, 1]} : vector<8x128xf32> to vector<8x16xf32>
    %272 = vector.extract_strided_slice %269 {offsets = [0, 32], sizes = [8, 16], strides = [1, 1]} : vector<8x128xf32> to vector<8x16xf32>
    %273 = vector.extract_strided_slice %270 {offsets = [0, 64], sizes = [8, 16], strides = [1, 1]} : vector<8x128xf32> to vector<8x16xf32>
    %274 = vector.extract_strided_slice %269 {offsets = [0, 96], sizes = [8, 16], strides = [1, 1]} : vector<8x128xf32> to vector<8x16xf32>
    %275 = arith.mulf %272, %259 : vector<8x16xf32>
    %276 = arith.mulf %271, %273 : vector<8x16xf32>
    %277 = arith.addf %275, %276 : vector<8x16xf32>
    %278 = math.tanh %277 : vector<8x16xf32>
    %279 = arith.mulf %274, %278 : vector<8x16xf32>
    %280 = arith.truncf %279 : vector<8x16xf32> to vector<8x16xbf16>
    %cst_47 = arith.constant dense<0.000000e+00> : vector<8x128xf32>
    %281 = tpu.matmul %280, %1, %cst_47 {dimension_numbers = #tpu.dot_dimension_numbers<[1], [0], [0], [1], [0, 0, 1, 1], [], []>} : vector<8x16xbf16>, vector<16x128xbf16>, vector<8x128xf32> -> vector<8x128xf32>
    %282 = arith.addf %169, %281 : vector<8x128xf32>
    %283 = arith.negf %282 : vector<8x128xf32>
    %284 = math.exp %283 : vector<8x128xf32>
    %cst_48 = arith.constant 1.000000e+00 : f32
    %285 = vector.broadcast %cst_48 : f32 to vector<8x128xf32>
    %286 = arith.addf %285, %284 : vector<8x128xf32>
    %287 = arith.divf %285, %286 : vector<8x128xf32>
    %288 = math.tanh %282 : vector<8x128xf32>
    %289 = vector.extract_strided_slice %287 {offsets = [0, 0], sizes = [8, 16], strides = [1, 1]} : vector<8x128xf32> to vector<8x16xf32>
    %290 = vector.extract_strided_slice %287 {offsets = [0, 32], sizes = [8, 16], strides = [1, 1]} : vector<8x128xf32> to vector<8x16xf32>
    %291 = vector.extract_strided_slice %288 {offsets = [0, 64], sizes = [8, 16], strides = [1, 1]} : vector<8x128xf32> to vector<8x16xf32>
    %292 = vector.extract_strided_slice %287 {offsets = [0, 96], sizes = [8, 16], strides = [1, 1]} : vector<8x128xf32> to vector<8x16xf32>
    %293 = arith.mulf %290, %277 : vector<8x16xf32>
    %294 = arith.mulf %289, %291 : vector<8x16xf32>
    %295 = arith.addf %293, %294 : vector<8x16xf32>
    %296 = math.tanh %295 : vector<8x16xf32>
    %297 = arith.mulf %292, %296 : vector<8x16xf32>
    %298 = arith.truncf %297 : vector<8x16xf32> to vector<8x16xbf16>
    %cst_49 = arith.constant dense<0.000000e+00> : vector<8x128xf32>
    %299 = tpu.matmul %298, %1, %cst_49 {dimension_numbers = #tpu.dot_dimension_numbers<[1], [0], [0], [1], [0, 0, 1, 1], [], []>} : vector<8x16xbf16>, vector<16x128xbf16>, vector<8x128xf32> -> vector<8x128xf32>
    %300 = arith.addf %169, %299 : vector<8x128xf32>
    %301 = arith.negf %300 : vector<8x128xf32>
    %302 = math.exp %301 : vector<8x128xf32>
    %cst_50 = arith.constant 1.000000e+00 : f32
    %303 = vector.broadcast %cst_50 : f32 to vector<8x128xf32>
    %304 = arith.addf %303, %302 : vector<8x128xf32>
    %305 = arith.divf %303, %304 : vector<8x128xf32>
    %306 = math.tanh %300 : vector<8x128xf32>
    %307 = vector.extract_strided_slice %305 {offsets = [0, 0], sizes = [8, 16], strides = [1, 1]} : vector<8x128xf32> to vector<8x16xf32>
    %308 = vector.extract_strided_slice %305 {offsets = [0, 32], sizes = [8, 16], strides = [1, 1]} : vector<8x128xf32> to vector<8x16xf32>
    %309 = vector.extract_strided_slice %306 {offsets = [0, 64], sizes = [8, 16], strides = [1, 1]} : vector<8x128xf32> to vector<8x16xf32>
    %310 = vector.extract_strided_slice %305 {offsets = [0, 96], sizes = [8, 16], strides = [1, 1]} : vector<8x128xf32> to vector<8x16xf32>
    %311 = arith.mulf %308, %295 : vector<8x16xf32>
    %312 = arith.mulf %307, %309 : vector<8x16xf32>
    %313 = arith.addf %311, %312 : vector<8x16xf32>
    %314 = math.tanh %313 : vector<8x16xf32>
    %315 = arith.mulf %310, %314 : vector<8x16xf32>
    %316 = tpu.concatenate %189, %207, %225, %243, %261, %279, %297, %315 in 1 : vector<8x16xf32>, vector<8x16xf32>, vector<8x16xf32>, vector<8x16xf32>, vector<8x16xf32>, vector<8x16xf32>, vector<8x16xf32>, vector<8x16xf32> -> vector<8x128xf32>
    %c0_51 = arith.constant 0 : index
    %c0_52 = arith.constant 0 : index
    %317 = vector.load %arg8[%c0_51, %c0_52] : memref<8x128xf32, #tpu.memory_space<vmem>>, vector<8x128xf32>
    tpu.vector_store %arg8[%c0_51, %c0_52], %316 {strides = array<i32>} : memref<8x128xf32, #tpu.memory_space<vmem>>, vector<8x128xf32>,
    return
  }
  func.func @transform_0(%arg0: i32) -> (i32, i32, i32) {
    %c0_i32 = arith.constant 0 : i32
    %c0_i32_0 = arith.constant 0 : i32
    %c0_i32_1 = arith.constant 0 : i32
    return %c0_i32, %arg0, %c0_i32_0 : i32, i32, i32
  }
  func.func @transform_1(%arg0: i32) -> (i32, i32) {
    %c0_i32 = arith.constant 0 : i32
    %c0_i32_0 = arith.constant 0 : i32
    %c0_i32_1 = arith.constant 0 : i32
    return %c0_i32, %c0_i32_0 : i32, i32
  }
  func.func @transform_2(%arg0: i32) -> (i32, i32) {
    %c0_i32 = arith.constant 0 : i32
    %c0_i32_0 = arith.constant 0 : i32
    %c0_i32_1 = arith.constant 0 : i32
    return %c0_i32, %c0_i32_0 : i32, i32
  }
  func.func @transform_3(%arg0: i32) -> (i32, i32) {
    %c0_i32 = arith.constant 0 : i32
    %c0_i32_0 = arith.constant 0 : i32
    %c0_i32_1 = arith.constant 0 : i32
    return %c0_i32, %c0_i32_0 : i32, i32
  }
  func.func @transform_4(%arg0: i32) -> (i32, i32) {
    %c0_i32 = arith.constant 0 : i32
    %c0_i32_0 = arith.constant 0 : i32
    %c0_i32_1 = arith.constant 0 : i32
    return %c0_i32, %c0_i32_0 : i32, i32
  }
  func.func @transform_5(%arg0: i32) -> (i32, i32) {
    %c0_i32 = arith.constant 0 : i32
    %c0_i32_0 = arith.constant 0 : i32
    %c0_i32_1 = arith.constant 0 : i32
    return %c0_i32, %c0_i32_0 : i32, i32
  }
  func.func @transform_6(%arg0: i32) -> (i32, i32) {
    %c0_i32 = arith.constant 0 : i32
    %c0_i32_0 = arith.constant 0 : i32
    %c0_i32_1 = arith.constant 0 : i32
    return %c0_i32, %c0_i32_0 : i32, i32
  }
  func.func @transform_7(%arg0: i32) -> (i32, i32) {
    %c0_i32 = arith.constant 0 : i32
    %c0_i32_0 = arith.constant 0 : i32
    return %arg0, %c0_i32 : i32, i32
  }
}

</mosaic_0001>

<bundles_post_ra>
// kernel: tpu_custom_call.1
= control target key start
LH: loop header
LB: loop body
LE: loop exit
PB: predicated region body
PF: predicated region fallthrough
CT: control target
= control target key end

     0   :  { %12 = vsyncpa [#allocation3], 0  ;;  %s2364_s0 = inlined_call_operand.hbm [shape: f32[8,8,16], index: 0, kind: input, shape index: {}]   ;;  %s2365_s1 = inlined_call_operand.hbm [shape: bf16[16,128], index: 1, kind: input, shape index: {}]   ;;  %s2366_s2 = inlined_call_operand.hbm [shape: bf16[32,128], index: 2, kind: input, shape index: {}]   ;;  %s2367_s3 = inlined_call_operand.vmem [shape: f32[1,128], index: 3, kind: input, shape index: {}]   ;;  %s2368_s4 = inlined_call_operand.hbm [shape: bf16[32,128], index: 4, kind: input, shape index: {}]   ;;  %s2369_s5 = inlined_call_operand.vmem [shape: bf16[16,128], index: 5, kind: input, shape index: {}]   ;;  %s2370_s6 = inlined_call_operand.vmem [shape: f32[1,128], index: 6, kind: input, shape index: {}]   ;;  %s2371_s7 = inlined_call_operand.hbm [shape: f32[8,128], index: 7, kind: output, shape index: {}]  }
   0x1   :  { %13 = vsyncpa [#allocation6], 0 }
   0x2   :  { %14 = vsyncpa [#allocation9], 0 }
   0x3   :  { %15 = vsyncpa [#allocation4], 0  ;;  %s1975_s24 = smov [#allocation5]   ;;  %s1857_s28 = scalar_lea.hbm %s2365_s1, 128 }
   0x4   :  { %s33_s25 = sshll.u32 %s1975_s24, 4  ;;  %p1858_p0 = scmp.ne.s32.totalorder %s2365_s1, %s1857_s28  ;;  %s34_s25 = int_to_ptr.vmem [resolvable:$true] %s33_s25 }
   0x5   :  { %p1861_p1 = scmp.lt.u32.totalorder %s1857_s28, %s2365_s1 }
   0x7   :  { %p1863_p2 = pnand %p1861_p1, %p1858_p0 }
   0x9   :  { %1866 = shalt.err (!%p1863_p2)
}
   0xa   :  { %s1867_s10 = scalar_lea.vmem %s34_s25, 128  ;;  %p1872_p4 = scmp.lt.s32.totalorder %s34_s25, %s34_s25 }
   0xb   :  { %p1868_p3 = scmp.ne.s32.totalorder %s34_s25, %s1867_s10  ;;  %p1873_p5 = scmp.lt.s32.totalorder %s1867_s10, %s1867_s10 }
   0xd   :  { %p1874_p6 = por %p1873_p5, %p1872_p4 }
   0xf   :  { %p1875_p7 = pnand %p1874_p6, %p1868_p3 }
  0x11   :  { %1878 = shalt.err (!%p1875_p7)
}
  0x12   :  { %s1976_s11 = smov 64   ;;  %s1977_s12 = smov 4  }
  0x13   :  { %39 = dma.hbm_to_vmem [thread:$0]  %s2365_s1, 128, %s34_s25, [#allocation6], %s1976_s11, %s1976_s11, %s1977_s12  }
  0x14   :  { %s1978_s15 = smov [#allocation2]   ;;  %s1879_s19 = scalar_lea.hbm %s2364_s0, 1024 }
  0x15   :  { %s21_s16 = sshll.u32 %s1978_s15, 4  ;;  %p1880_p8 = scmp.ne.s32.totalorder %s2364_s0, %s1879_s19  ;;  %s22_s16 = int_to_ptr.vmem [resolvable:$true] %s21_s16 }
  0x16   :  { %p1883_p9 = scmp.lt.u32.totalorder %s1879_s19, %s2364_s0 }
  0x18   :  { %p1885_p10 = pnand %p1883_p9, %p1880_p8 }
  0x1a   :  { %1888 = shalt.err (!%p1885_p10)
}
  0x1b   :  { %s1889_s24 = scalar_lea.vmem %s22_s16, 1024  ;;  %p1894_p12 = scmp.lt.s32.totalorder %s22_s16, %s22_s16 }
  0x1c   :  { %p1890_p11 = scmp.ne.s32.totalorder %s22_s16, %s1889_s24  ;;  %p1895_p13 = scmp.lt.s32.totalorder %s1889_s24, %s1889_s24 }
  0x1e   :  { %p1896_p0 = por %p1895_p13, %p1894_p12 }
  0x20   :  { %p1897_p1 = pnand %p1896_p0, %p1890_p11 }
  0x22   :  { %1900 = shalt.err (!%p1897_p1)
}
  0x23   :  { %s1979_s1 = smov 128   ;;  %s1980_s25 = smov 8  }
  0x24   :  { %27 = dma.hbm_to_vmem [thread:$0]  %s2364_s0, 1024, %s22_s16, [#allocation3], %s1979_s1, %s1979_s1, %s1980_s25  }
  0x25   :  { %s1981_s28 = smov [#allocation7]   ;;  %s1982_s30 = smov [#allocation8]  }
  0x26   :  { %s45_s29 = sshll.u32 %s1981_s28, 4  ;;  %s59_s8 = sshll.u32 %s1982_s30, 4  ;;  %s46_s29 = int_to_ptr.vmem [resolvable:$true] %s45_s29  ;;  %s2060_s8 = int_to_ptr.vmem [resolvable:$true] %s59_s8 }
  0x27   :  { %s1901_s13 = scalar_lea.hbm %s2366_s2, 256 }
  0x28   :  { %p1902_p2 = scmp.ne.s32.totalorder %s2366_s2, %s1901_s13  ;;  %p1905_p3 = scmp.lt.u32.totalorder %s1901_s13, %s2366_s2 }
  0x2a   :  { %p1907_p4 = pnand %p1905_p3, %p1902_p2 }
  0x2c   :  { %1910 = shalt.err (!%p1907_p4)
}
  0x2d   :  { %s1911_s0 = scalar_lea.vmem %s46_s29, 256  ;;  %p1916_p6 = scmp.lt.s32.totalorder %s46_s29, %s46_s29 }
  0x2e   :  { %p1912_p5 = scmp.ne.s32.totalorder %s46_s29, %s1911_s0  ;;  %p1917_p7 = scmp.lt.s32.totalorder %s1911_s0, %s1911_s0 }
  0x30   :  { %p1918_p8 = por %p1917_p7, %p1916_p6 }
  0x32   :  { %p1919_p9 = pnand %p1918_p8, %p1912_p5 }
  0x34   :  { %1922 = shalt.err (!%p1919_p9)
}
  0x35   :  { %51 = dma.hbm_to_vmem [thread:$0]  %s2366_s2, 256, %s46_s29, [#allocation6], %s1976_s11, %s1976_s11, %s1977_s12  }
  0x36   :  { %s1923_s22 = scalar_lea.hbm %s2368_s4, 256 }
  0x37   :  { %p1924_p10 = scmp.ne.s32.totalorder %s2368_s4, %s1923_s22  ;;  %p1927_p11 = scmp.lt.u32.totalorder %s1923_s22, %s2368_s4 }
  0x39   :  { %p1929_p12 = pnand %p1927_p11, %p1924_p10 }
  0x3b   :  { %1932 = shalt.err (!%p1929_p12)
}
  0x3c   :  { %s1933_s26 = scalar_lea.vmem %s2060_s8, 256  ;;  %p1938_p0 = scmp.lt.s32.totalorder %s2060_s8, %s2060_s8 }
  0x3d   :  { %p1934_p13 = scmp.ne.s32.totalorder %s2060_s8, %s1933_s26  ;;  %p1939_p1 = scmp.lt.s32.totalorder %s1933_s26, %s1933_s26 }
  0x3f   :  { %p1940_p2 = por %p1939_p1, %p1938_p0 }
  0x41   :  { %p1941_p3 = pnand %p1940_p2, %p1934_p13 }
  0x43   :  { %1944 = shalt.err (!%p1941_p3)
}
  0x44   :  { %65 = dma.hbm_to_vmem [thread:$0]  %s2368_s4, 256, %s2060_s8, [#allocation9], %s1976_s11, %s1976_s11, %s1977_s12  }
  0x45   :  { %1967 = dma.done.wait [#allocation3], 1024  }
  0x46   :  { %1968 = vsyncadd [#allocation3], 4294966272 }
  0x47   :  { %1969 = dma.done.wait [#allocation6], 384  }
  0x48   :  { %1970 = vsyncadd [#allocation6], 4294966912 }
  0x49   :  { %1971 = dma.done.wait [#allocation9], 256  }
  0x4a   :  { %1972 = vsyncadd [#allocation9], 4294967040  ;;  %v1983_v0 = vmov 0.0   ;;  %vm1984_vm0 = vmmov 0   ;;  %v1723_v1 = vld [vmem:[#allocation5] sm:$0xff]   ;;  %v2100_v2 = vld [vmem:[#allocation7] sm:$0xff]  }
  0x4b   :  { %1585 = vmatprep.subr.bf16.mxu1 %v1983_v0  ;;  %1589 = vmatprep.mubr.msk.bf16.mxu1 %vm1984_vm0, %v1983_v0  ;;  %v89_v3 = vld [vmem:[#allocation2] sm:$0xff]  ;;  %v90_v4 = vld [vmem:[#allocation2 + $0x8] sm:$0xff]  ;;  %vm116_vm1 = vcmask 130048   ;;  %v91_v5 = vld [vmem:[#allocation2 + $0x10] sm:$0xff]  ;;  %v1985_v10 = vmov 0   ;;  %vm206_vm2 = vcmask 261120  }
  0x4c   :  { %1575 = vmatprep.subr.bf16.mxu0 %v1723_v1  ;;  %1586 = vmatpush3.bf16.msra.mxu1 %v2100_v2  ;;  %v97_v6 = vpack.c.bf16 %v90_v4, %v89_v3  ;;  %v92_v7 = vld [vmem:[#allocation2 + $0x18] sm:$0xff]  ;;  %v2104_v9 = vld [vmem:[#allocation7 + $0x8] sm:$0xff]   ;;  %v2125_v11 = vld [vmem:[%s2367_s3] ss:$0 sm:$0xff]  ;;  %s1986_s3 = smov 32   ;;  %s1988_s8 = smov 48  }
  0x4d   :  { %1576 = vmatpush3.bf16.msra.mxu0 %v1723_v1  ;;  %1587 = vmatprep.subr.bf16.mxu1 %v1983_v0  ;;  %v98_v8 = vpack.c.bf16 %v92_v7, %v91_v5  ;;  %v93_v53 = vld [vmem:[#allocation2 + $0x20] sm:$0xff]  ;;  %v94_v54 = vld [vmem:[#allocation2 + $0x28] sm:$0xff]  ;;  %v95_v55 = vld [vmem:[#allocation2 + $0x30] sm:$0xff]  ;;  %s1989_s9 = smov 80   ;;  %s1990_s10 = smov 112   ;;  %vm1456_vm3 = vcmask 392192  }
  0x4e   :  { %1601 = vmatprep.subr.bf16.mxu0 %v1983_v0  ;;  %1577 = vmatprep.mubr.msk.bf16.mxu0 %vm116_vm1, %v97_v6  ;;  %v99_v56 = vpack.c.bf16 %v94_v54, %v93_v53  ;;  %v96_v57 = vld [vmem:[#allocation2 + $0x38] sm:$0xff]  ;;  %s1991_s13 = smov 16   ;;  %vm1458_vm4 = vcmask 523264   ;;  %vm1460_vm5 = vcmask 654336   ;;  %vm1462_vm6 = vcmask 785408  }
  0x4f   :  { %v100_v58 = vpack.c.bf16 %v96_v57, %v95_v55  ;;  %vm1464_vm7 = vcmask 916480  }
  0x50   :  { %1578 = vmatmul.mubr.msk.bf16.vlgmr.msra.gmra.mrb[0].mxu0 %vm116_vm1, %v98_v8  ;;  %1588 = vmatpush3.bf16.msra.mxu1 %v2104_v9 }
  0x51   :  { %1602 = vmatpush3.bf16.msra.mxu0 %v2100_v2  ;;  %1593 = vmatprep.subr.bf16.mxu1 %v1983_v0 }
  0x52   :  { %1603 = vmatprep.subr.bf16.mxu0 %v1983_v0  ;;  %1581 = vmatprep.mubr.msk.bf16.mxu0 %vm116_vm1, %v99_v56 }
  0x53   :  { %1590 = vmatmul.mubr.bf16.vlgmr.msra.gmra.mrb[0].mxu1 %v1985_v10 }
  0x54   :  { %1594 = vmatpush3.bf16.msra.mxu1 %v2100_v2  ;;  %1597 = vmatprep.mubr.msk.bf16.mxu1 %vm1984_vm0, %v1983_v0 }
  0x55   :  { %1595 = vmatprep.subr.bf16.mxu1 %v1983_v0  ;;  %1604 = vmatpush3.bf16.msra.mxu0 %v2104_v9 }
  0x56   :  { %1617 = vmatprep.subr.bf16.mxu0 %v1983_v0 }
  0x58   :  { %1596 = vmatpush3.bf16.msra.mxu1 %v2104_v9  ;;  %1582 = vmatmul.mubr.msk.bf16.gmra.mrb[4].mxu0 %vm116_vm1, %v100_v58 }
  0x59   :  { %1609 = vmatprep.subr.bf16.mxu1 %v1983_v0  ;;  %1605 = vmatprep.mubr.msk.bf16.mxu0 %vm1984_vm0, %v1983_v0 }
 0x123   :  { %v2127_v12 = vpop.f32.mrb[0].mxu0 }
 0x124   :  { %v163_v13 = vpop.f32.mrb[1].mxu0  ;;  %v172_v6 = vadd.f32 %v2127_v12, %v2125_v11 }
 0x125   :  { %v164_v14 = vadd.f32 %v2125_v11, %v163_v13  ;;  %v2130_v15 = vpop.f32.mrb[2].mxu0 }
 0x126   :  { %v166_v16 = vpop.f32.mrb[3].mxu0  ;;  %v244_v17 = vpop.f32.mrb[0].mxu1 }
 0x127   :  { %v250_v18 = vadd.f32 %v244_v17, %v164_v14  ;;  %v1591_v19 = vpop.f32.mrb[1].mxu1  ;;  %v167_v37 = vadd.f32 %v2125_v11, %v166_v16 }
 0x128   :  { %v247_v20 = vpop.f32.mrb[2].mxu1 }
 0x129   :  { %v1592_v21 = vpop.f32.mrb[3].mxu1  ;;  %1729 = vtanh.f32 %v250_v18  ;;  %v1492_v23 = vmul.f32 -1.442695, %v250_v18 }
 0x12b   :  { %1731 = vpow2.f32 %v1492_v23  ;;  %v2152_v63 = vpop.f32.mrb[4].mxu0 }
 0x12c   :  { %v2154_v1 = vpop.f32.mrb[5].mxu0 }
 0x12d   :  { %v2156_v3 = vpop.f32.mrb[6].mxu0 }
 0x12e   :  { %v2158_v4 = vpop.f32.mrb[7].mxu0 }
 0x133   :  { %v1730_v22 = vpop.eup %1729 }
 0x134   :  { %260 = vrot.lane.b32.xlu0 %v1730_v22, %s1976_s11 }
 0x135   :  { %v1732_v24 = vpop.eup %1731 }
 0x136   :  { %v254_v25 = vadd.f32 1.0, %v1732_v24 }
 0x138   :  { %1733 = vrcp.f32 %v254_v25 }
 0x142   :  { %v1734_v26 = vpop.eup %1733 }
 0x143   :  { %v258_v29 = vmul.f32 0.0, %v1734_v26 }
 0x1a6   :  { %v261_v27 = vpop.permute.xlu0 %260 }
 0x1a7   :  { %v263_v28 = vmul.f32 %v1734_v26, %v261_v27 }
 0x1a9   :  { %265 = vrot.lane.b32.xlu0 %v263_v28, %s1986_s3 }
 0x21b   :  { %v266_v30 = vpop.permute.xlu0 %265 }
 0x21c   :  { %v268_v31 = vadd.f32 %v266_v30, %v258_v29 }
 0x21e   :  { %1735 = vtanh.f32 %v268_v31 }
 0x228   :  { %v1736_v32 = vpop.eup %1735 }
 0x229   :  { %271 = vrot.lane.b32.xlu1 %v1736_v32, %s1976_s11 }
 0x29b   :  { %v272_v33 = vpop.permute.xlu1 %271 }
 0x29c   :  { %v274_v34 = vmul.f32 %v1734_v26, %v272_v33 }
 0x29e   :  { %v275_v35 = vpack.c.bf16 %v274_v34, %v274_v34 }
 0x2a0   :  { %277 = vrot.lane.b32.xlu1 %v275_v35, %s1986_s3 }
 0x312   :  { %v278_v36 = vpop.permute.xlu1 %277 }
 0x313   :  { %1598 = vmatmul.mubr.msk.bf16.vlgmr.msra.gmra.mrb[4].mxu1 %vm206_vm2, %v278_v36 }
 0x314   :  { %1610 = vmatpush3.bf16.msra.mxu1 %v2100_v2  ;;  %1613 = vmatprep.mubr.msk.bf16.mxu1 %vm1984_vm0, %v1983_v0 }
 0x315   :  { %1611 = vmatprep.subr.bf16.mxu1 %v1983_v0 }
 0x318   :  { %1612 = vmatpush3.bf16.msra.mxu1 %v2104_v9 }
 0x319   :  { %1625 = vmatprep.subr.bf16.mxu1 %v1983_v0 }
 0x3e6   :  { %v316_v38 = vpop.f32.mrb[4].mxu1 }
 0x3e7   :  { %v322_v39 = vadd.f32 %v316_v38, %v167_v37  ;;  %v1599_v40 = vpop.f32.mrb[5].mxu1 }
 0x3e8   :  { %v319_v41 = vpop.f32.mrb[6].mxu1 }
 0x3e9   :  { %1737 = vtanh.f32 %v322_v39  ;;  %v1600_v42 = vpop.f32.mrb[7].mxu1  ;;  %v1494_v44 = vmul.f32 -1.442695, %v322_v39 }
 0x3eb   :  { %1739 = vpow2.f32 %v1494_v44 }
 0x3f3   :  { %v1738_v43 = vpop.eup %1737 }
 0x3f4   :  { %332 = vrot.lane.b32.xlu0 %v1738_v43, %s1976_s11 }
 0x3f5   :  { %v1740_v45 = vpop.eup %1739 }
 0x3f6   :  { %v326_v46 = vadd.f32 1.0, %v1740_v45 }
 0x3f8   :  { %1741 = vrcp.f32 %v326_v46 }
 0x402   :  { %v1742_v47 = vpop.eup %1741 }
 0x403   :  { %v330_v50 = vmul.f32 %v1742_v47, %v268_v31  ;;  %v175_v31 = vadd.f32 %v2130_v15, %v2125_v11 }
 0x466   :  { %v333_v48 = vpop.permute.xlu0 %332 }
 0x467   :  { %v335_v49 = vmul.f32 %v1742_v47, %v333_v48 }
 0x469   :  { %337 = vrot.lane.b32.xlu1 %v335_v49, %s1986_s3 }
 0x4db   :  { %v338_v51 = vpop.permute.xlu1 %337 }
 0x4dc   :  { %v340_v52 = vadd.f32 %v338_v51, %v330_v50  ;;  %v180_v51 = vadd.f32 %v2125_v11, %v2154_v1 }
 0x4de   :  { %1743 = vtanh.f32 %v340_v52 }
 0x4e8   :  { %v1744_v59 = vpop.eup %1743 }
 0x4e9   :  { %343 = vrot.lane.b32.xlu0 %v1744_v59, %s1976_s11 }
 0x55b   :  { %v344_v60 = vpop.permute.xlu0 %343 }
 0x55c   :  { %v346_v61 = vmul.f32 %v1742_v47, %v344_v60 }
 0x55e   :  { %v347_v62 = vpack.c.bf16 %v346_v61, %v346_v61 }
 0x560   :  { %349 = vrot.lane.b32.xlu1 %v347_v62, %s1986_s3 }
 0x5d2   :  { %v350_v5 = vpop.permute.xlu1 %349 }
 0x5d3   :  { %1606 = vmatmul.mubr.msk.bf16.vlgmr.msra.gmra.mrb[8].mxu0 %vm206_vm2, %v350_v5 }
 0x5d4   :  { %1618 = vmatpush3.bf16.msra.mxu0 %v2100_v2  ;;  %1621 = vmatprep.mubr.msk.bf16.mxu0 %vm1984_vm0, %v1983_v0 }
 0x5d5   :  { %1619 = vmatprep.subr.bf16.mxu0 %v1983_v0 }
 0x5d8   :  { %1620 = vmatpush3.bf16.msra.mxu0 %v2104_v9 }
 0x5d9   :  { %1633 = vmatprep.subr.bf16.mxu0 %v1983_v0 }
 0x6a6   :  { %v388_v7 = vpop.f32.mrb[8].mxu0 }
 0x6a7   :  { %v394_v8 = vadd.f32 %v388_v7, %v172_v6  ;;  %v1607_v13 = vpop.f32.mrb[9].mxu0 }
 0x6a8   :  { %v391_v14 = vpop.f32.mrb[10].mxu0 }
 0x6a9   :  { %1745 = vtanh.f32 %v394_v8  ;;  %v1608_v16 = vpop.f32.mrb[11].mxu0  ;;  %v1496_v18 = vmul.f32 -1.442695, %v394_v8 }
 0x6ab   :  { %1747 = vpow2.f32 %v1496_v18  ;;  %v183_v18 = vadd.f32 %v2125_v11, %v2158_v4 }
 0x6b3   :  { %v1746_v17 = vpop.eup %1745 }
 0x6b4   :  { %404 = vrot.lane.b32.xlu0 %v1746_v17, %s1976_s11 }
 0x6b5   :  { %v1748_v19 = vpop.eup %1747 }
 0x6b6   :  { %v398_v20 = vadd.f32 1.0, %v1748_v19 }
 0x6b8   :  { %1749 = vrcp.f32 %v398_v20 }
 0x6c2   :  { %v1750_v21 = vpop.eup %1749 }
 0x6c3   :  { %v402_v12 = vmul.f32 %v1750_v21, %v340_v52 }
 0x726   :  { %v405_v22 = vpop.permute.xlu0 %404 }
 0x727   :  { %v407_v23 = vmul.f32 %v1750_v21, %v405_v22 }
 0x729   :  { %409 = vrot.lane.b32.xlu1 %v407_v23, %s1986_s3 }
 0x79b   :  { %v410_v24 = vpop.permute.xlu1 %409 }
 0x79c   :  { %v412_v25 = vadd.f32 %v410_v24, %v402_v12 }
 0x79e   :  { %1751 = vtanh.f32 %v412_v25 }
 0x7a8   :  { %v1752_v26 = vpop.eup %1751 }
 0x7a9   :  { %415 = vrot.lane.b32.xlu0 %v1752_v26, %s1976_s11 }
 0x81b   :  { %v416_v27 = vpop.permute.xlu0 %415 }
 0x81c   :  { %v418_v28 = vmul.f32 %v1750_v21, %v416_v27 }
 0x81e   :  { %v419_v29 = vpack.c.bf16 %v418_v28, %v418_v28 }
 0x820   :  { %421 = vrot.lane.b32.xlu1 %v419_v29, %s1986_s3 }
 0x892   :  { %v422_v30 = vpop.permute.xlu1 %421 }
 0x893   :  { %1614 = vmatmul.mubr.msk.bf16.vlgmr.msra.gmra.mrb[8].mxu1 %vm206_vm2, %v422_v30 }
 0x894   :  { %1626 = vmatpush3.bf16.msra.mxu1 %v2100_v2  ;;  %1629 = vmatprep.mubr.msk.bf16.mxu1 %vm1984_vm0, %v1983_v0 }
 0x895   :  { %1627 = vmatprep.subr.bf16.mxu1 %v1983_v0 }
 0x898   :  { %1628 = vmatpush3.bf16.msra.mxu1 %v2104_v9 }
 0x899   :  { %1641 = vmatprep.subr.bf16.mxu1 %v1983_v0 }
 0x966   :  { %v460_v32 = vpop.f32.mrb[8].mxu1 }
 0x967   :  { %v466_v33 = vadd.f32 %v460_v32, %v175_v31  ;;  %v1615_v34 = vpop.f32.mrb[9].mxu1 }
 0x968   :  { %v463_v35 = vpop.f32.mrb[10].mxu1 }
 0x969   :  { %1753 = vtanh.f32 %v466_v33  ;;  %v1616_v36 = vpop.f32.mrb[11].mxu1  ;;  %v1498_v38 = vmul.f32 -1.442695, %v466_v33  ;;  %v188_v35 = vadd.f32 %v2152_v63, %v2125_v11 }
 0x96b   :  { %1755 = vpow2.f32 %v1498_v38 }
 0x973   :  { %v1754_v37 = vpop.eup %1753 }
 0x974   :  { %476 = vrot.lane.b32.xlu0 %v1754_v37, %s1976_s11 }
 0x975   :  { %v1756_v39 = vpop.eup %1755 }
 0x976   :  { %v470_v40 = vadd.f32 1.0, %v1756_v39 }
 0x978   :  { %1757 = vrcp.f32 %v470_v40 }
 0x982   :  { %v1758_v41 = vpop.eup %1757 }
 0x983   :  { %v474_v15 = vmul.f32 %v1758_v41, %v412_v25 }
 0x9e6   :  { %v477_v42 = vpop.permute.xlu0 %476 }
 0x9e7   :  { %v479_v43 = vmul.f32 %v1758_v41, %v477_v42 }
 0x9e9   :  { %481 = vrot.lane.b32.xlu1 %v479_v43, %s1986_s3 }
 0xa5b   :  { %v482_v44 = vpop.permute.xlu1 %481 }
 0xa5c   :  { %v484_v45 = vadd.f32 %v482_v44, %v474_v15 }
 0xa5e   :  { %1759 = vtanh.f32 %v484_v45 }
 0xa68   :  { %v1760_v46 = vpop.eup %1759 }
 0xa69   :  { %487 = vrot.lane.b32.xlu0 %v1760_v46, %s1976_s11 }
 0xadb   :  { %v488_v47 = vpop.permute.xlu0 %487 }
 0xadc   :  { %v490_v48 = vmul.f32 %v1758_v41, %v488_v47 }
 0xade   :  { %v491_v49 = vpack.c.bf16 %v490_v48, %v490_v48 }
 0xae0   :  { %493 = vrot.lane.b32.xlu1 %v491_v49, %s1986_s3 }
 0xb52   :  { %v494_v50 = vpop.permute.xlu1 %493 }
 0xb53   :  { %1622 = vmatmul.mubr.msk.bf16.vlgmr.msra.gmra.mrb[12].mxu0 %vm206_vm2, %v494_v50 }
 0xb54   :  { %1634 = vmatpush3.bf16.msra.mxu0 %v2100_v2  ;;  %1637 = vmatprep.mubr.msk.bf16.mxu0 %vm1984_vm0, %v1983_v0 }
 0xb55   :  { %1635 = vmatprep.subr.bf16.mxu0 %v1983_v0 }
 0xb58   :  { %1636 = vmatpush3.bf16.msra.mxu0 %v2104_v9 }
 0xb59   :  { %1649 = vmatprep.subr.bf16.mxu0 %v1983_v0 }
 0xc26   :  { %v532_v52 = vpop.f32.mrb[12].mxu0 }
 0xc27   :  { %v538_v53 = vadd.f32 %v532_v52, %v180_v51  ;;  %v1623_v54 = vpop.f32.mrb[13].mxu0 }
 0xc28   :  { %v535_v55 = vpop.f32.mrb[14].mxu0  ;;  %v191_v54 = vadd.f32 %v2156_v3, %v2125_v11 }
 0xc29   :  { %1761 = vtanh.f32 %v538_v53  ;;  %v1624_v56 = vpop.f32.mrb[15].mxu0  ;;  %v1500_v58 = vmul.f32 -1.442695, %v538_v53 }
 0xc2b   :  { %1763 = vpow2.f32 %v1500_v58 }
 0xc33   :  { %v1762_v57 = vpop.eup %1761 }
 0xc34   :  { %548 = vrot.lane.b32.xlu0 %v1762_v57, %s1976_s11 }
 0xc35   :  { %v1764_v59 = vpop.eup %1763 }
 0xc36   :  { %v542_v60 = vadd.f32 1.0, %v1764_v59 }
 0xc38   :  { %1765 = vrcp.f32 %v542_v60 }
 0xc42   :  { %v1766_v61 = vpop.eup %1765 }
 0xc43   :  { %v546_v1 = vmul.f32 %v1766_v61, %v484_v45 }
 0xca6   :  { %v549_v62 = vpop.permute.xlu0 %548 }
 0xca7   :  { %v551_v5 = vmul.f32 %v1766_v61, %v549_v62 }
 0xca9   :  { %553 = vrot.lane.b32.xlu1 %v551_v5, %s1986_s3 }
 0xd1b   :  { %v554_v6 = vpop.permute.xlu1 %553 }
 0xd1c   :  { %v556_v7 = vadd.f32 %v554_v6, %v546_v1 }
 0xd1e   :  { %1767 = vtanh.f32 %v556_v7 }
 0xd28   :  { %v1768_v8 = vpop.eup %1767 }
 0xd29   :  { %559 = vrot.lane.b32.xlu0 %v1768_v8, %s1976_s11 }
 0xd9b   :  { %v560_v13 = vpop.permute.xlu0 %559 }
 0xd9c   :  { %v562_v14 = vmul.f32 %v1766_v61, %v560_v13  ;;  %v1726_v13 = vld [vmem:[#allocation8] sm:$0xff]  }
 0xd9e   :  { %v563_v16 = vpack.c.bf16 %v562_v14, %v562_v14  ;;  %v2231_v14 = vld [vmem:[%s2369_s5] sm:$0xff]  }
 0xda0   :  { %565 = vrot.lane.b32.xlu1 %v563_v16, %s1986_s3  ;;  %v1728_v16 = vld [vmem:[#allocation8 + $0x8] sm:$0xff]  }
 0xe12   :  { %v566_v17 = vpop.permute.xlu1 %565 }
 0xe13   :  { %1630 = vmatmul.mubr.msk.bf16.vlgmr.msra.gmra.mrb[12].mxu1 %vm206_vm2, %v566_v17 }
 0xe14   :  { %1642 = vmatpush3.bf16.msra.mxu1 %v2100_v2  ;;  %1645 = vmatprep.mubr.msk.bf16.mxu1 %vm1984_vm0, %v1983_v0 }
 0xe15   :  { %1643 = vmatprep.subr.bf16.mxu1 %v1983_v0 }
 0xe18   :  { %1644 = vmatpush3.bf16.msra.mxu1 %v2104_v9 }
 0xe19   :  { %1657 = vmatprep.subr.bf16.mxu1 %v1983_v0 }
 0xee6   :  { %v604_v19 = vpop.f32.mrb[12].mxu1 }
 0xee7   :  { %v610_v20 = vadd.f32 %v604_v19, %v183_v18  ;;  %v1631_v21 = vpop.f32.mrb[13].mxu1 }
 0xee8   :  { %v607_v22 = vpop.f32.mrb[14].mxu1 }
 0xee9   :  { %1769 = vtanh.f32 %v610_v20  ;;  %v1632_v23 = vpop.f32.mrb[15].mxu1  ;;  %v1502_v2 = vmul.f32 -1.442695, %v610_v20 }
 0xeeb   :  { %1771 = vpow2.f32 %v1502_v2  ;;  %v1507_v2 = vld [vmem:[%s2370_s6] ss:$0 sm:$0xff]  ;;  %s1987_s6 = smov 96  }
 0xef3   :  { %v1770_v12 = vpop.eup %1769 }
 0xef4   :  { %620 = vrot.lane.b32.xlu0 %v1770_v12, %s1976_s11 }
 0xef5   :  { %v1772_v24 = vpop.eup %1771 }
 0xef6   :  { %v614_v25 = vadd.f32 1.0, %v1772_v24 }
 0xef8   :  { %1773 = vrcp.f32 %v614_v25 }
 0xf02   :  { %v1774_v9 = vpop.eup %1773 }
 0xf03   :  { %v618_v4 = vmul.f32 %v1774_v9, %v556_v7 }
 0xf66   :  { %v621_v26 = vpop.permute.xlu0 %620 }
 0xf67   :  { %v623_v27 = vmul.f32 %v1774_v9, %v621_v26 }
 0xf69   :  { %625 = vrot.lane.b32.xlu1 %v623_v27, %s1986_s3 }
 0xfdb   :  { %v626_v28 = vpop.permute.xlu1 %625 }
 0xfdc   :  { %v628_v29 = vadd.f32 %v626_v28, %v618_v4 }
 0xfde   :  { %1775 = vtanh.f32 %v628_v29 }
 0xfe8   :  { %v1776_v30 = vpop.eup %1775 }
 0xfe9   :  { %631 = vrot.lane.b32.xlu0 %v1776_v30, %s1976_s11 }
0x105b   :  { %v632_v31 = vpop.permute.xlu0 %631 }
0x105c   :  { %v634_v32 = vmul.f32 %v1774_v9, %v632_v31 }
0x105e   :  { %v635_v33 = vpack.c.bf16 %v634_v32, %v634_v32 }
0x1060   :  { %637 = vrot.lane.b32.xlu1 %v635_v33, %s1986_s3 }
0x10d2   :  { %v638_v34 = vpop.permute.xlu1 %637 }
0x10d3   :  { %1638 = vmatmul.mubr.msk.bf16.vlgmr.msra.gmra.mrb[16].mxu0 %vm206_vm2, %v638_v34 }
0x10d4   :  { %1653 = vmatprep.mubr.msk.bf16.mxu0 %vm1984_vm0, %v1983_v0  ;;  %1650 = vmatpush3.bf16.msra.mxu0 %v1726_v13 }
0x10d5   :  { %1651 = vmatprep.subr.bf16.mxu0 %v1983_v0 }
0x10d8   :  { %1652 = vmatpush3.bf16.msra.mxu0 %v1728_v16 }
0x10d9   :  { %1663 = vmatprep.subr.bf16.mxu0 %v1983_v0 }
0x11a6   :  { %v676_v36 = vpop.f32.mrb[16].mxu0 }
0x11a7   :  { %v682_v37 = vadd.f32 %v676_v36, %v188_v35  ;;  %v1639_v38 = vpop.f32.mrb[17].mxu0 }
0x11a8   :  { %v679_v39 = vpop.f32.mrb[18].mxu0 }
0x11a9   :  { %1777 = vtanh.f32 %v682_v37  ;;  %v1640_v40 = vpop.f32.mrb[19].mxu0  ;;  %v1504_v42 = vmul.f32 -1.442695, %v682_v37 }
0x11ab   :  { %1779 = vpow2.f32 %v1504_v42 }
0x11b3   :  { %v1778_v41 = vpop.eup %1777 }
0x11b4   :  { %692 = vrot.lane.b32.xlu0 %v1778_v41, %s1976_s11 }
0x11b5   :  { %v1780_v43 = vpop.eup %1779 }
0x11b6   :  { %v686_v15 = vadd.f32 1.0, %v1780_v43 }
0x11b8   :  { %1781 = vrcp.f32 %v686_v15 }
0x11c2   :  { %v1782_v44 = vpop.eup %1781 }
0x11c3   :  { %v690_v63 = vmul.f32 %v1782_v44, %v628_v29 }
0x1226   :  { %v693_v45 = vpop.permute.xlu0 %692 }
0x1227   :  { %v695_v46 = vmul.f32 %v1782_v44, %v693_v45 }
0x1229   :  { %697 = vrot.lane.b32.xlu1 %v695_v46, %s1986_s3 }
0x129b   :  { %v698_v47 = vpop.permute.xlu1 %697 }
0x129c   :  { %v700_v48 = vadd.f32 %v698_v47, %v690_v63 }
0x129e   :  { %1783 = vtanh.f32 %v700_v48 }
0x12a8   :  { %v1784_v49 = vpop.eup %1783 }
0x12a9   :  { %703 = vrot.lane.b32.xlu0 %v1784_v49, %s1976_s11 }
0x131b   :  { %v704_v50 = vpop.permute.xlu0 %703 }
0x131c   :  { %v706_v51 = vmul.f32 %v1782_v44, %v704_v50 }
0x131e   :  { %v707_v52 = vpack.c.bf16 %v706_v51, %v706_v51 }
0x1320   :  { %709 = vrot.lane.b32.xlu1 %v707_v52, %s1986_s3 }
0x1392   :  { %v710_v53 = vpop.permute.xlu1 %709 }
0x1393   :  { %1646 = vmatmul.mubr.msk.bf16.vlgmr.msra.gmra.mrb[16].mxu1 %vm206_vm2, %v710_v53 }
0x1394   :  { %1659 = vmatprep.mubr.msk.bf16.mxu1 %vm1984_vm0, %v1983_v0  ;;  %1658 = vmatpush3.bf16.msra.mxu1 %v2231_v14 }
0x1395   :  { %1669 = vmatprep.subr.bf16.mxu1 %v1983_v0 }
0x139b   :  { %1660 = vmatmul.mubr.bf16.vlgmr.msra.gmra.mrb[20].mxu1 %v1985_v10 }
0x139c   :  { %1670 = vmatpush3.bf16.msra.mxu1 %v2231_v14  ;;  %1671 = vmatprep.mubr.msk.bf16.mxu1 %vm1984_vm0, %v1983_v0 }
0x139d   :  { %1681 = vmatprep.subr.bf16.mxu1 %v1983_v0 }
0x1466   :  { %v748_v55 = vpop.f32.mrb[16].mxu1 }
0x1467   :  { %v754_v56 = vadd.f32 %v748_v55, %v191_v54  ;;  %v1647_v57 = vpop.f32.mrb[17].mxu1 }
0x1468   :  { %v751_v58 = vpop.f32.mrb[18].mxu1 }
0x1469   :  { %1785 = vtanh.f32 %v754_v56  ;;  %v1648_v59 = vpop.f32.mrb[19].mxu1  ;;  %v1506_v61 = vmul.f32 -1.442695, %v754_v56 }
0x146b   :  { %1787 = vpow2.f32 %v1506_v61 }
0x146e   :  { %v891_v21 = vpop.f32.mrb[20].mxu1 }
0x146f   :  { %v1661_v10 = vpop.f32.mrb[21].mxu1 }
0x1470   :  { %v894_v22 = vpop.f32.mrb[22].mxu1 }
0x1471   :  { %v1662_v23 = vpop.f32.mrb[23].mxu1 }
0x1473   :  { %v1786_v60 = vpop.eup %1785 }
0x1474   :  { %764 = vrot.lane.b32.xlu0 %v1786_v60, %s1976_s11 }
0x1475   :  { %v1788_v62 = vpop.eup %1787 }
0x1476   :  { %v758_v5 = vadd.f32 1.0, %v1788_v62 }
0x1478   :  { %1789 = vrcp.f32 %v758_v5 }
0x1482   :  { %v1790_v1 = vpop.eup %1789 }
0x1483   :  { %v762_v11 = vmul.f32 %v1790_v1, %v700_v48 }
0x14e6   :  { %v765_v6 = vpop.permute.xlu0 %764 }
0x14e7   :  { %v767_v7 = vmul.f32 %v1790_v1, %v765_v6 }
0x14e9   :  { %769 = vrot.lane.b32.xlu1 %v767_v7, %s1986_s3 }
0x155b   :  { %v770_v3 = vpop.permute.xlu1 %769 }
0x155c   :  { %v772_v8 = vadd.f32 %v770_v3, %v762_v11 }
0x155e   :  { %1791 = vtanh.f32 %v772_v8 }
0x1568   :  { %v1792_v17 = vpop.eup %1791 }
0x1569   :  { %775 = vrot.lane.b32.xlu0 %v1792_v17, %s1976_s11 }
0x15db   :  { %v776_v18 = vpop.permute.xlu0 %775 }
0x15dc   :  { %v778_v19 = vmul.f32 %v1790_v1, %v776_v18 }
0x15de   :  { %v779_v20 = vpack.c.bf16 %v778_v19, %v778_v19 }
0x15e0   :  { %792 = vrot.lane.b32.xlu1 %v779_v20, %s1986_s3 }
0x1652   :  { %v793_v12 = vpop.permute.xlu1 %792 }
0x1653   :  { %1654 = vmatmul.mubr.msk.bf16.vlgmr.msra.gmra.mrb[20].mxu0 %vm206_vm2, %v793_v12 }
0x1654   :  { %1664 = vmatpush3.bf16.msra.mxu0 %v2231_v14  ;;  %1665 = vmatprep.mubr.msk.bf16.mxu0 %vm1984_vm0, %v1983_v0 }
0x1655   :  { %1675 = vmatprep.subr.bf16.mxu0 %v1983_v0 }
0x1726   :  { %v843_v24 = vpop.f32.mrb[20].mxu0 }
0x1727   :  { %v2252_v25 = vadd.f32 %v1507_v2, %v843_v24  ;;  %v1655_v9 = vpop.f32.mrb[21].mxu0 }
0x1728   :  { %v846_v26 = vpop.f32.mrb[22].mxu0 }
0x1729   :  { %v1656_v27 = vpop.f32.mrb[23].mxu0  ;;  %v897_v4 = vadd.f32 %v891_v21, %v2252_v25 }
0x172b   :  { %1793 = vtanh.f32 %v897_v4  ;;  %v1512_v29 = vmul.f32 -1.442695, %v897_v4 }
0x172d   :  { %1795 = vpow2.f32 %v1512_v29 }
0x1735   :  { %v1794_v28 = vpop.eup %1793 }
0x1736   :  { %907 = vrot.lane.b32.xlu0 %v1794_v28, %s1976_s11 }
0x1737   :  { %v1796_v30 = vpop.eup %1795 }
0x1738   :  { %v901_v31 = vadd.f32 1.0, %v1796_v30 }
0x173a   :  { %1797 = vrcp.f32 %v901_v31 }
0x1744   :  { %v1798_v32 = vpop.eup %1797 }
0x1745   :  { %v905_v35 = vmul.f32 0.0, %v1798_v32 }
0x17a8   :  { %v908_v33 = vpop.permute.xlu0 %907 }
0x17a9   :  { %v910_v34 = vmul.f32 %v1798_v32, %v908_v33 }
0x17ab   :  { %912 = vrot.lane.b32.xlu1 %v910_v34, %s1986_s3 }
0x181d   :  { %v913_v36 = vpop.permute.xlu1 %912 }
0x181e   :  { %v915_v37 = vadd.f32 %v913_v36, %v905_v35 }
0x1820   :  { %1799 = vtanh.f32 %v915_v37 }
0x182a   :  { %v1800_v38 = vpop.eup %1799 }
0x182b   :  { %918 = vrot.lane.b32.xlu0 %v1800_v38, %s1976_s11 }
0x189d   :  { %v919_v39 = vpop.permute.xlu0 %918 }
0x189e   :  { %v2258_v40 = vmul.f32 %v1798_v32, %v919_v39 }
0x18a0   :  { %v922_v41 = vpack.c.bf16 %v2258_v40, %v2258_v40 }
0x18a2   :  { %924 = vrot.lane.b32.xlu1 %v922_v41, %s1986_s3 }
0x1914   :  { %v925_v42 = vpop.permute.xlu1 %924 }
0x1915   :  { %1666 = vmatmul.mubr.msk.bf16.vlgmr.msra.gmra.mrb[24].mxu0 %vm116_vm1, %v925_v42 }
0x1916   :  { %1676 = vmatpush3.bf16.msra.mxu0 %v2231_v14  ;;  %1677 = vmatprep.mubr.msk.bf16.mxu0 %vm1984_vm0, %v1983_v0 }
0x1917   :  { %1687 = vmatprep.subr.bf16.mxu0 %v1983_v0 }
0x19e8   :  { %v963_v43 = vpop.f32.mrb[24].mxu0 }
0x19e9   :  { %v969_v15 = vadd.f32 %v963_v43, %v2252_v25  ;;  %v1667_v44 = vpop.f32.mrb[25].mxu0 }
0x19ea   :  { %v966_v45 = vpop.f32.mrb[26].mxu0 }
0x19eb   :  { %1801 = vtanh.f32 %v969_v15  ;;  %v1668_v46 = vpop.f32.mrb[27].mxu0  ;;  %v1514_v47 = vmul.f32 -1.442695, %v969_v15 }
0x19ed   :  { %1803 = vpow2.f32 %v1514_v47 }
0x19f5   :  { %v1802_v63 = vpop.eup %1801 }
0x19f6   :  { %979 = vrot.lane.b32.xlu0 %v1802_v63, %s1976_s11 }
0x19f7   :  { %v1804_v48 = vpop.eup %1803 }
0x19f8   :  { %v973_v49 = vadd.f32 1.0, %v1804_v48 }
0x19fa   :  { %1805 = vrcp.f32 %v973_v49 }
0x1a04   :  { %v1806_v50 = vpop.eup %1805 }
0x1a05   :  { %v977_v53 = vmul.f32 %v1806_v50, %v915_v37 }
0x1a68   :  { %v980_v51 = vpop.permute.xlu0 %979 }
0x1a69   :  { %v982_v52 = vmul.f32 %v1806_v50, %v980_v51 }
0x1a6b   :  { %984 = vrot.lane.b32.xlu1 %v982_v52, %s1986_s3 }
0x1add   :  { %v985_v54 = vpop.permute.xlu1 %984 }
0x1ade   :  { %v987_v55 = vadd.f32 %v985_v54, %v977_v53 }
0x1ae0   :  { %1807 = vtanh.f32 %v987_v55 }
0x1aea   :  { %v1808_v56 = vpop.eup %1807 }
0x1aeb   :  { %990 = vrot.lane.b32.xlu0 %v1808_v56, %s1976_s11 }
0x1b5d   :  { %v991_v57 = vpop.permute.xlu0 %990 }
0x1b5e   :  { %v2272_v58 = vmul.f32 %v1806_v50, %v991_v57 }
0x1b60   :  { %v994_v59 = vpack.c.bf16 %v2272_v58, %v2272_v58 }
0x1b62   :  { %996 = vrot.lane.b32.xlu1 %v994_v59, %s1986_s3 }
0x1bd4   :  { %v997_v60 = vpop.permute.xlu1 %996 }
0x1bd5   :  { %1672 = vmatmul.mubr.msk.bf16.vlgmr.msra.gmra.mrb[24].mxu1 %vm116_vm1, %v997_v60 }
0x1bd6   :  { %1682 = vmatpush3.bf16.msra.mxu1 %v2231_v14  ;;  %1683 = vmatprep.mubr.msk.bf16.mxu1 %vm1984_vm0, %v1983_v0 }
0x1bd7   :  { %1693 = vmatprep.subr.bf16.mxu1 %v1983_v0 }
0x1ca8   :  { %v1035_v61 = vpop.f32.mrb[24].mxu1 }
0x1ca9   :  { %v1041_v62 = vadd.f32 %v1035_v61, %v2252_v25  ;;  %v1673_v5 = vpop.f32.mrb[25].mxu1 }
0x1caa   :  { %v1038_v1 = vpop.f32.mrb[26].mxu1 }
0x1cab   :  { %1809 = vtanh.f32 %v1041_v62  ;;  %v1674_v6 = vpop.f32.mrb[27].mxu1  ;;  %v1516_v11 = vmul.f32 -1.442695, %v1041_v62 }
0x1cad   :  { %1811 = vpow2.f32 %v1516_v11 }
0x1cb5   :  { %v1810_v7 = vpop.eup %1809 }
0x1cb6   :  { %1051 = vrot.lane.b32.xlu0 %v1810_v7, %s1976_s11 }
0x1cb7   :  { %v1812_v3 = vpop.eup %1811 }
0x1cb8   :  { %v1045_v8 = vadd.f32 1.0, %v1812_v3 }
0x1cba   :  { %1813 = vrcp.f32 %v1045_v8 }
0x1cc4   :  { %v1814_v13 = vpop.eup %1813 }
0x1cc5   :  { %v1049_v18 = vmul.f32 %v1814_v13, %v987_v55 }
0x1d28   :  { %v1052_v16 = vpop.permute.xlu0 %1051 }
0x1d29   :  { %v1054_v17 = vmul.f32 %v1814_v13, %v1052_v16 }
0x1d2b   :  { %1056 = vrot.lane.b32.xlu1 %v1054_v17, %s1986_s3 }
0x1d9d   :  { %v1057_v19 = vpop.permute.xlu1 %1056 }
0x1d9e   :  { %v1059_v20 = vadd.f32 %v1057_v19, %v1049_v18 }
0x1da0   :  { %1815 = vtanh.f32 %v1059_v20 }
0x1daa   :  { %v1816_v21 = vpop.eup %1815 }
0x1dab   :  { %1062 = vrot.lane.b32.xlu0 %v1816_v21, %s1976_s11 }
0x1e1d   :  { %v1063_v10 = vpop.permute.xlu0 %1062 }
0x1e1e   :  { %v2286_v22 = vmul.f32 %v1814_v13, %v1063_v10 }
0x1e20   :  { %v1066_v23 = vpack.c.bf16 %v2286_v22, %v2286_v22 }
0x1e22   :  { %1068 = vrot.lane.b32.xlu1 %v1066_v23, %s1986_s3 }
0x1e94   :  { %v1069_v12 = vpop.permute.xlu1 %1068 }
0x1e95   :  { %1678 = vmatmul.mubr.msk.bf16.vlgmr.msra.gmra.mrb[28].mxu0 %vm116_vm1, %v1069_v12 }
0x1e96   :  { %1688 = vmatpush3.bf16.msra.mxu0 %v2231_v14  ;;  %1689 = vmatprep.mubr.msk.bf16.mxu0 %vm1984_vm0, %v1983_v0 }
0x1e97   :  { %1699 = vmatprep.subr.bf16.mxu0 %v1983_v0 }
0x1f68   :  { %v1107_v2 = vpop.f32.mrb[28].mxu0 }
0x1f69   :  { %v1113_v24 = vadd.f32 %v1107_v2, %v2252_v25  ;;  %v1679_v9 = vpop.f32.mrb[29].mxu0 }
0x1f6a   :  { %v1110_v26 = vpop.f32.mrb[30].mxu0 }
0x1f6b   :  { %1817 = vtanh.f32 %v1113_v24  ;;  %v1680_v27 = vpop.f32.mrb[31].mxu0  ;;  %v1518_v28 = vmul.f32 -1.442695, %v1113_v24 }
0x1f6d   :  { %1819 = vpow2.f32 %v1518_v28 }
0x1f75   :  { %v1818_v4 = vpop.eup %1817 }
0x1f76   :  { %1123 = vrot.lane.b32.xlu0 %v1818_v4, %s1976_s11 }
0x1f77   :  { %v1820_v29 = vpop.eup %1819 }
0x1f78   :  { %v1117_v30 = vadd.f32 1.0, %v1820_v29 }
0x1f7a   :  { %1821 = vrcp.f32 %v1117_v30 }
0x1f84   :  { %v1822_v31 = vpop.eup %1821 }
0x1f85   :  { %v1121_v34 = vmul.f32 %v1822_v31, %v1059_v20 }
0x1fe8   :  { %v1124_v32 = vpop.permute.xlu0 %1123 }
0x1fe9   :  { %v1126_v33 = vmul.f32 %v1822_v31, %v1124_v32 }
0x1feb   :  { %1128 = vrot.lane.b32.xlu1 %v1126_v33, %s1986_s3 }
0x205d   :  { %v1129_v35 = vpop.permute.xlu1 %1128 }
0x205e   :  { %v1131_v36 = vadd.f32 %v1129_v35, %v1121_v34 }
0x2060   :  { %1823 = vtanh.f32 %v1131_v36 }
0x206a   :  { %v1824_v37 = vpop.eup %1823 }
0x206b   :  { %1134 = vrot.lane.b32.xlu0 %v1824_v37, %s1976_s11 }
0x20dd   :  { %v1135_v38 = vpop.permute.xlu0 %1134 }
0x20de   :  { %v2300_v39 = vmul.f32 %v1822_v31, %v1135_v38 }
0x20e0   :  { %v1138_v41 = vpack.c.bf16 %v2300_v39, %v2300_v39 }
0x20e2   :  { %1140 = vrot.lane.b32.xlu1 %v1138_v41, %s1986_s3 }
0x2154   :  { %v1141_v42 = vpop.permute.xlu1 %1140 }
0x2155   :  { %1684 = vmatmul.mubr.msk.bf16.vlgmr.msra.gmra.mrb[28].mxu1 %vm116_vm1, %v1141_v42 }
0x2156   :  { %1694 = vmatpush3.bf16.msra.mxu1 %v2231_v14  ;;  %1695 = vmatprep.mubr.msk.bf16.mxu1 %vm1984_vm0, %v1983_v0 }
0x2228   :  { %v1179_v43 = vpop.f32.mrb[28].mxu1 }
0x2229   :  { %v1185_v15 = vadd.f32 %v1179_v43, %v2252_v25  ;;  %v1685_v44 = vpop.f32.mrb[29].mxu1 }
0x222a   :  { %v1182_v45 = vpop.f32.mrb[30].mxu1 }
0x222b   :  { %1825 = vtanh.f32 %v1185_v15  ;;  %v1686_v46 = vpop.f32.mrb[31].mxu1  ;;  %v1520_v47 = vmul.f32 -1.442695, %v1185_v15 }
0x222d   :  { %1827 = vpow2.f32 %v1520_v47 }
0x2235   :  { %v1826_v63 = vpop.eup %1825 }
0x2236   :  { %1195 = vrot.lane.b32.xlu0 %v1826_v63, %s1976_s11 }
0x2237   :  { %v1828_v48 = vpop.eup %1827 }
0x2238   :  { %v1189_v49 = vadd.f32 1.0, %v1828_v48 }
0x223a   :  { %1829 = vrcp.f32 %v1189_v49 }
0x2244   :  { %v1830_v50 = vpop.eup %1829 }
0x2245   :  { %v1193_v53 = vmul.f32 %v1830_v50, %v1131_v36 }
0x22a8   :  { %v1196_v51 = vpop.permute.xlu0 %1195 }
0x22a9   :  { %v1198_v52 = vmul.f32 %v1830_v50, %v1196_v51 }
0x22ab   :  { %1200 = vrot.lane.b32.xlu1 %v1198_v52, %s1986_s3 }
0x231d   :  { %v1201_v54 = vpop.permute.xlu1 %1200 }
0x231e   :  { %v1203_v55 = vadd.f32 %v1201_v54, %v1193_v53 }
0x2320   :  { %1831 = vtanh.f32 %v1203_v55 }
0x232a   :  { %v1832_v56 = vpop.eup %1831 }
0x232b   :  { %1206 = vrot.lane.b32.xlu0 %v1832_v56, %s1976_s11 }
0x239d   :  { %v1207_v57 = vpop.permute.xlu0 %1206 }
0x239e   :  { %v2313_v59 = vmul.f32 %v1830_v50, %v1207_v57 }
0x23a0   :  { %v1210_v60 = vpack.c.bf16 %v2313_v59, %v2313_v59 }
0x23a2   :  { %1212 = vrot.lane.b32.xlu1 %v1210_v60, %s1986_s3 }
0x2414   :  { %v1213_v61 = vpop.permute.xlu1 %1212 }
0x2415   :  { %1690 = vmatmul.mubr.msk.bf16.vlgmr.msra.gmra.mrb[32].mxu0 %vm116_vm1, %v1213_v61 }
0x2416   :  { %1700 = vmatpush3.bf16.msra.mxu0 %v2231_v14  ;;  %1701 = vmatprep.mubr.msk.bf16.mxu0 %vm1984_vm0, %v1983_v0 }
0x24e8   :  { %v1251_v62 = vpop.f32.mrb[32].mxu0 }
0x24e9   :  { %v1257_v5 = vadd.f32 %v1251_v62, %v2252_v25  ;;  %v1691_v1 = vpop.f32.mrb[33].mxu0 }
0x24ea   :  { %v1254_v6 = vpop.f32.mrb[34].mxu0 }
0x24eb   :  { %1833 = vtanh.f32 %v1257_v5  ;;  %v1692_v7 = vpop.f32.mrb[35].mxu0  ;;  %v1522_v3 = vmul.f32 -1.442695, %v1257_v5 }
0x24ed   :  { %1835 = vpow2.f32 %v1522_v3 }
0x24f5   :  { %v1834_v11 = vpop.eup %1833 }
0x24f6   :  { %1267 = vrot.lane.b32.xlu0 %v1834_v11, %s1976_s11 }
0x24f7   :  { %v1836_v8 = vpop.eup %1835 }
0x24f8   :  { %v1261_v13 = vadd.f32 1.0, %v1836_v8 }
0x24fa   :  { %1837 = vrcp.f32 %v1261_v13 }
0x2504   :  { %v1838_v16 = vpop.eup %1837 }
0x2505   :  { %v1265_v0 = vmul.f32 %v1838_v16, %v1203_v55 }
0x2568   :  { %v1268_v14 = vpop.permute.xlu0 %1267 }
0x2569   :  { %v1270_v17 = vmul.f32 %v1838_v16, %v1268_v14 }
0x256b   :  { %1272 = vrot.lane.b32.xlu1 %v1270_v17, %s1986_s3 }
0x25dd   :  { %v1273_v18 = vpop.permute.xlu1 %1272 }
0x25de   :  { %v1275_v19 = vadd.f32 %v1273_v18, %v1265_v0 }
0x25e0   :  { %1839 = vtanh.f32 %v1275_v19 }
0x25ea   :  { %v1840_v20 = vpop.eup %1839 }
0x25eb   :  { %1278 = vrot.lane.b32.xlu0 %v1840_v20, %s1976_s11 }
0x265d   :  { %v1279_v21 = vpop.permute.xlu0 %1278 }
0x265e   :  { %v2326_v10 = vmul.f32 %v1838_v16, %v1279_v21 }
0x2660   :  { %v1282_v23 = vpack.c.bf16 %v2326_v10, %v2326_v10 }
0x2662   :  { %1284 = vrot.lane.b32.xlu1 %v1282_v23, %s1986_s3 }
0x26d4   :  { %v1285_v12 = vpop.permute.xlu1 %1284 }
0x26d5   :  { %1696 = vmatmul.mubr.msk.bf16.vlgmr.msra.gmra.mrb[32].mxu1 %vm116_vm1, %v1285_v12 }
0x27a8   :  { %v1323_v2 = vpop.f32.mrb[32].mxu1 }
0x27a9   :  { %v1329_v24 = vadd.f32 %v1323_v2, %v2252_v25  ;;  %v1697_v9 = vpop.f32.mrb[33].mxu1 }
0x27aa   :  { %v1326_v26 = vpop.f32.mrb[34].mxu1 }
0x27ab   :  { %1841 = vtanh.f32 %v1329_v24  ;;  %v1698_v27 = vpop.f32.mrb[35].mxu1  ;;  %v1524_v28 = vmul.f32 -1.442695, %v1329_v24 }
0x27ad   :  { %1843 = vpow2.f32 %v1524_v28 }
0x27b5   :  { %v1842_v4 = vpop.eup %1841 }
0x27b6   :  { %1339 = vrot.lane.b32.xlu0 %v1842_v4, %s1976_s11 }
0x27b7   :  { %v1844_v29 = vpop.eup %1843 }
0x27b8   :  { %v1333_v30 = vadd.f32 1.0, %v1844_v29 }
0x27ba   :  { %1845 = vrcp.f32 %v1333_v30 }
0x27c4   :  { %v1846_v31 = vpop.eup %1845 }
0x27c5   :  { %v1337_v34 = vmul.f32 %v1846_v31, %v1275_v19 }
0x2828   :  { %v1340_v32 = vpop.permute.xlu0 %1339 }
0x2829   :  { %v1342_v33 = vmul.f32 %v1846_v31, %v1340_v32 }
0x282b   :  { %1344 = vrot.lane.b32.xlu1 %v1342_v33, %s1986_s3 }
0x289d   :  { %v1345_v35 = vpop.permute.xlu1 %1344 }
0x289e   :  { %v1347_v36 = vadd.f32 %v1345_v35, %v1337_v34 }
0x28a0   :  { %1847 = vtanh.f32 %v1347_v36 }
0x28aa   :  { %v1848_v37 = vpop.eup %1847 }
0x28ab   :  { %1350 = vrot.lane.b32.xlu0 %v1848_v37, %s1976_s11 }
0x291d   :  { %v1351_v38 = vpop.permute.xlu0 %1350 }
0x291e   :  { %v1353_v41 = vmul.f32 %v1846_v31, %v1351_v38 }
0x2920   :  { %v1354_v42 = vpack.c.bf16 %v1353_v41, %v1353_v41 }
0x2922   :  { %1356 = vrot.lane.b32.xlu1 %v1354_v42, %s1986_s3 }
0x2994   :  { %v1357_v43 = vpop.permute.xlu1 %1356 }
0x2995   :  { %1702 = vmatmul.mubr.msk.bf16.vlgmr.msra.gmra.mrb[36].mxu0 %vm116_vm1, %v1357_v43 }
0x2a68   :  { %v1395_v15 = vpop.f32.mrb[36].mxu0 }
0x2a69   :  { %v1401_v44 = vadd.f32 %v1395_v15, %v2252_v25  ;;  %v1703_v45 = vpop.f32.mrb[37].mxu0 }
0x2a6a   :  { %v1398_v46 = vpop.f32.mrb[38].mxu0 }
0x2a6b   :  { %1849 = vtanh.f32 %v1401_v44  ;;  %v1704_v63 = vpop.f32.mrb[39].mxu0  ;;  %v1526_v48 = vmul.f32 -1.442695, %v1401_v44 }
0x2a6d   :  { %1851 = vpow2.f32 %v1526_v48 }
0x2a75   :  { %v1850_v47 = vpop.eup %1849 }
0x2a76   :  { %1411 = vrot.lane.b32.xlu0 %v1850_v47, %s1976_s11 }
0x2a77   :  { %v1852_v49 = vpop.eup %1851 }
0x2a78   :  { %v1405_v50 = vadd.f32 1.0, %v1852_v49 }
0x2a7a   :  { %1853 = vrcp.f32 %v1405_v50 }
0x2a84   :  { %v1854_v51 = vpop.eup %1853 }
0x2a85   :  { %v1409_v25 = vmul.f32 %v1854_v51, %v1347_v36 }
0x2ae8   :  { %v1412_v52 = vpop.permute.xlu0 %1411 }
0x2ae9   :  { %v1414_v53 = vmul.f32 %v1854_v51, %v1412_v52 }
0x2aeb   :  { %1416 = vrot.lane.b32.xlu1 %v1414_v53, %s1986_s3 }
0x2aef   :  { %1427 = vrot.lane.b32.xlu1 %v2258_v40, %s1986_s3 }
0x2af3   :  { %1435 = vrot.lane.b32.xlu1 %v2286_v22, %s1976_s11 }
0x2af7   :  { %1443 = vrot.lane.b32.xlu1 %v2313_v59, %s1987_s6 }
0x2b5d   :  { %v1417_v54 = vpop.permute.xlu1 %1416 }
0x2b5e   :  { %v1419_v55 = vadd.f32 %v1417_v54, %v1409_v25 }
0x2b60   :  { %1855 = vtanh.f32 %v1419_v55 }
0x2b61   :  { %v1428_v59 = vpop.permute.xlu1 %1427 }
0x2b65   :  { %v1436_v61 = vpop.permute.xlu1 %1435 }
0x2b69   :  { %v1444_v1 = vpop.permute.xlu1 %1443 }
0x2b6a   :  { %v1856_v56 = vpop.eup %1855 }
0x2b6b   :  { %1422 = vrot.lane.b32.xlu0 %v1856_v56, %s1976_s11  ;;  %s1992_s11 = smov [#allocation10]  }
0x2b6c   :  { %s1473_s14 = sshll.u32 %s1992_s11, 4  ;;  %s1474_s14 = int_to_ptr.vmem [resolvable:$true] %s1473_s14 }
0x2b6d   :  { %s1945_s15 = scalar_lea.vmem %s1474_s14, 128  ;;  %p1950_p5 = scmp.lt.s32.totalorder %s1474_s14, %s1474_s14 }
0x2b6e   :  { %p1946_p4 = scmp.ne.s32.totalorder %s1474_s14, %s1945_s15  ;;  %p1951_p6 = scmp.lt.s32.totalorder %s1945_s15, %s1945_s15 }
0x2b6f   :  { %1431 = vrot.lane.b32.xlu0 %v2272_v58, %s1988_s8 }
0x2b70   :  { %p1952_p7 = por %p1951_p6, %p1950_p5 }
0x2b72   :  { %p1953_p8 = pnand %p1952_p7, %p1946_p4 }
0x2b73   :  { %1439 = vrot.lane.b32.xlu0 %v2300_v39, %s1989_s9 }
0x2b77   :  { %1447 = vrot.lane.b32.xlu0 %v2326_v10, %s1990_s10 }
0x2bdd   :  { %v1423_v40 = vpop.permute.xlu0 %1422 }
0x2bde   :  { %v1425_v22 = vmul.f32 %v1854_v51, %v1423_v40 }
0x2be0   :  { %1451 = vrot.lane.b32.xlu1 %v1425_v22, %s1991_s13 }
0x2be1   :  { %v1432_v57 = vpop.permute.xlu0 %1431 }
0x2be2   :  { %v1454_v62 = vsel %vm116_vm1, %v1428_v59, %v1432_v57 }
0x2be3   :  { %v1455_v5 = vsel %vm206_vm2, %v1454_v62, %v1436_v61 }
0x2be5   :  { %v1440_v60 = vpop.permute.xlu0 %1439 }
0x2be6   :  { %v1457_v58 = vsel %vm1456_vm3, %v1455_v5, %v1440_v60 }
0x2be7   :  { %v1459_v6 = vsel %vm1458_vm4, %v1457_v58, %v1444_v1 }
0x2be9   :  { %v1448_v39 = vpop.permute.xlu0 %1447 }
0x2bea   :  { %v1461_v7 = vsel %vm1460_vm5, %v1459_v6, %v1448_v39 }
0x2beb   :  { %v1463_v3 = vsel %vm1462_vm6, %v1461_v7, %v1353_v41 }
0x2c52   :  { %v1452_v11 = vpop.permute.xlu1 %1451 }
0x2c53   :  { %v1465_v8 = vsel %vm1464_vm7, %v1463_v3, %v1452_v11 }
0x2c54   :  { %1466 = vst [vmem:[#allocation10] sm:$0xff] %v1465_v8 }
0x2c55   :  { %1956 = shalt.err (!%p1953_p8)
}
0x2c56   :  { %s1957_s0 = scalar_lea.hbm %s2371_s7, 128 }
0x2c57   :  { %p1958_p9 = scmp.ne.s32.totalorder %s2371_s7, %s1957_s0  ;;  %p1961_p10 = scmp.lt.u32.totalorder %s1957_s0, %s2371_s7 }
0x2c59   :  { %p1963_p11 = pnand %p1961_p10, %p1958_p9 }
0x2c5b   :  { %1966 = shalt.err (!%p1963_p11)
}
0x2c5c   :  { %1476 = dma.vmem_to_hbm [thread:$0]  %s1474_s14, 128, %s2371_s7, [#allocation4]  }
0x2c5d   :  { %1973 = dma.done.wait [#allocation4], 128  }
0x2c5e   :  { %1974 = vsyncadd [#allocation4], 4294967168 }
0x2c5f   :  { %1480 = vsyncpa [#allocation3], 1 }
0x2c60   :  { %1481 = vsyncpa [#allocation6], 1 }
0x2c61   :  { %1482 = vsyncpa [#allocation9], 1 }
0x2c62   :  { %1483 = vsyncpa [#allocation4], 1 }

</bundles_post_ra>
